<compile_context>
chip_gen: v7x
topology: tpu7x:2x2x1
jax: 0.10.0
libtpu: 0.0.40
codegen_flags: <defaults>
</compile_context>

<pallas_src>
import functools

import jax
import jax.numpy as jnp
from jax.experimental import pallas as pl
from jax.experimental.pallas import tpu as pltpu


# ---------------------------------------------------------------------------
# Fused RCAB kernel: whole batch in one invocation, everything in VMEM.
# ---------------------------------------------------------------------------
def rcab_kernel(x_ref, wb_ref, bv_ref, o_ref, xp_ref, pad_ref, *, H, W, NC):
    # x_ref  : (NC, H, W)    NCHW input with N and C flattened (free reshape)
    # wb_ref : (4, 3, L, L)  banded weights, one (L, L) per (conv k, dy tap)
    # bv_ref : (4, 1, L)     bias vectors in the packed lane layout
    # o_ref  : (NC, H, W)    output, same layout as the input
    # xp_ref : (H, L)        scratch: packed input (kept for the residual)
    # pad_ref: (H+2, L)      scratch: vertically zero-padded working buffer
    L = NC * W

    # --- relayout NCHW -> packed (H, L), lane = (n*C + c)*W + w -------------
    # Fuses the layout change into the kernel: no wrapper-side transpose op.
    for j in range(NC):
        xp_ref[:, j * W:(j + 1) * W] = x_ref[j]

    # Zero only the two vertical pad rows (interior is rewritten before every
    # conv; horizontal padding is handled by the banded weights).
    zrow = jnp.zeros((1, L), jnp.float32)
    pad_ref[0:1, :] = zrow
    pad_ref[H + 1:H + 2, :] = zrow

    def conv(img, k):
        # 3x3 SAME conv as 3 shifted-slice matmuls directly off pad_ref
        # (no im2col slab, no store-then-reload of a col buffer).
        pad_ref[1:H + 1, :] = img
        acc = jnp.dot(pad_ref[0:H, :], wb_ref[k, 0],
                      preferred_element_type=jnp.float32)
        acc += jnp.dot(pad_ref[1:H + 1, :], wb_ref[k, 1],
                       preferred_element_type=jnp.float32)
        acc += jnp.dot(pad_ref[2:H + 2, :], wb_ref[k, 2],
                       preferred_element_type=jnp.float32)
        return acc + bv_ref[k]

    x2 = xp_ref[...]                                          # (H, L)

    # conv_layer1: conv -> ReLU -> conv
    out1 = conv(jnp.maximum(conv(x2, 0), 0.0), 1)
    # conv_layer2 on sigmoid(out1): conv -> ReLU -> conv, then sigmoid
    out2 = jax.nn.sigmoid(
        conv(jnp.maximum(conv(jax.nn.sigmoid(out1), 2), 0.0), 3))

    # channel-attention multiply + residual
    y = x2 + out2 * out1                                      # (H, L)

    # --- relayout packed -> NCHW output --------------------------------------
    for j in range(NC):
        o_ref[j] = y[:, j * W:(j + 1) * W]


# ---------------------------------------------------------------------------
# One-time parameter prep:
#   torch Conv2d (Cout, Cin, 3, 3) -> 3 banded matrices (one per dy) of shape
#   (N*C*W, N*C*W) with the dx taps and horizontal SAME padding folded in:
#     W_dy[(n*C+ci)*W + x', (n*C+co)*W + x] = w[co, ci, dy, x - x' + 1]
#   for |x - x'| <= 1, zero otherwise; plus a tiled bias vector.
# ---------------------------------------------------------------------------
def _band_weights(w, b, W, N):
    cout, cin, kh, kw = w.shape
    assert (kh, kw) == (3, 3) and cin == cout, "RCAB needs square 3x3 convs"
    w = w.astype(jnp.float32)
    # shift[dx][x', x] = 1  iff  x' = x + dx - 1  (band implements the padding)
    shift = (jnp.eye(W, k=1, dtype=jnp.float32),
             jnp.eye(W, k=0, dtype=jnp.float32),
             jnp.eye(W, k=-1, dtype=jnp.float32))
    eye_n = jnp.eye(N, dtype=jnp.float32)
    bands = []
    for dy in range(3):
        band = sum(jnp.kron(w[:, :, dy, dx].T, shift[dx]) for dx in range(3))
        bands.append(jnp.kron(eye_n, band))      # block-diagonal over batch
    wband = jnp.stack(bands)                      # (3, N*C*W, N*C*W)
    bvec = jnp.tile(jnp.repeat(b.astype(jnp.float32), W), N).reshape(1, -1)
    return wband, bvec


def prepare_params(params, *, W, N):
    # NOTE: the banded weight scales as O((W*C)^2); for real SR widths this
    # must become a W-row-tiled scheme with bf16 (fp8 on v7x) weights and an
    # explicit per-generation VMEM budget.  Fine at the toy test shape.
    w1a, b1a, w1b, b1b, w2a, b2a, w2b, b2b = params
    pairs = [(w1a, b1a), (w1b, b1b), (w2a, b2a), (w2b, b2b)]
    wb, bv = zip(*[_band_weights(w, b, W, N) for w, b in pairs])
    return jnp.stack(wb), jnp.stack(bv)           # (4, 3, L, L), (4, 1, L)


# ---------------------------------------------------------------------------
# Forward: single fused pallas_call, grid=(), no wrapper transposes.
# ---------------------------------------------------------------------------
@jax.jit
def rcab_forward(x_nchw, wbands, bvecs):
    N, C, H, W = x_nchw.shape
    NC, L = N * C, N * C * W
    assert wbands.shape == (4, 3, L, L) and bvecs.shape == (4, 1, L), \
        "prepared params do not match the input shape (run prepare_params)"

    # Free reshape (no data movement): flatten N and C.
    x_flat = x_nchw.reshape(NC, H, W).astype(jnp.float32)

    kernel = functools.partial(rcab_kernel, H=H, W=W, NC=NC)
    vmem = pl.BlockSpec(memory_space=pltpu.MemorySpace.VMEM)

    nbytes = (x_flat.size + wbands.size + bvecs.size + NC * H * W) * 4
    y_flat = pl.pallas_call(
        kernel,
        out_shape=jax.ShapeDtypeStruct((NC, H, W), jnp.float32),
        in_specs=[vmem, vmem, vmem],
        out_specs=vmem,
        scratch_shapes=[
            pltpu.VMEM((H, L), jnp.float32),       # packed input (residual)
            pltpu.VMEM((H + 2, L), jnp.float32),   # vertically padded buffer
        ],
        compiler_params=pltpu.CompilerParams(
            vmem_limit_bytes=32 * 1024 * 1024),
        cost_estimate=pl.CostEstimate(
            flops=4 * 3 * 2 * H * L * L + 12 * H * L,
            transcendentals=2 * H * L,
            bytes_accessed=nbytes),
    )(x_flat, wbands, bvecs)

    return y_flat.reshape(N, C, H, W)


# ---------------------------------------------------------------------------
# Parameter init (torch Conv2d layout) + pure-JAX reference for checking.
# ---------------------------------------------------------------------------
def init_params(key, in_ch, out_ch):
    assert in_ch == out_ch, "residual add requires in_channels == out_channels"
    ks = jax.random.split(key, 8)

    def conv_p(kw, kb, cin, cout):
        w = 0.1 * jax.random.normal(kw, (cout, cin, 3, 3), jnp.float32)
        b = 0.1 * jax.random.normal(kb, (cout,), jnp.float32)
        return w, b

    w1a, b1a = conv_p(ks[0], ks[1], in_ch, out_ch)
    w1b, b1b = conv_p(ks[2], ks[3], out_ch, out_ch)
    w2a, b2a = conv_p(ks[4], ks[5], out_ch, out_ch)
    w2b, b2b = conv_p(ks[6], ks[7], out_ch, out_ch)
    return (w1a, b1a, w1b, b1b, w2a, b2a, w2b, b2b)


def _conv_ref(x_nhwc, w, b):
    wn = jnp.transpose(w, (2, 3, 1, 0))   # HWIO
    y = jax.lax.conv_general_dilated(
        x_nhwc, wn, (1, 1), "SAME",
        dimension_numbers=("NHWC", "HWIO", "NHWC"),
        precision=jax.lax.Precision.HIGHEST)
    return y + b


def rcab_reference(x_nchw, params):
    w1a, b1a, w1b, b1b, w2a, b2a, w2b, b2b = params
    x = jnp.transpose(x_nchw, (0, 2, 3, 1)).astype(jnp.float32)
    out1 = _conv_ref(jnp.maximum(_conv_ref(x, w1a, b1a), 0.0), w1b, b1b)
    h = jax.nn.sigmoid(out1)
    out2 = _conv_ref(jnp.maximum(_conv_ref(h, w2a, b2a), 0.0), w2b, b2b)
    out2 = jax.nn.sigmoid(out2)
    y = x + out2 * out1
    return jnp.transpose(y, (0, 3, 1, 2))


if __name__ == "__main__":
    key = jax.random.PRNGKey(0)
    k_x, k_p = jax.random.split(key)

    N, C, H, W = 2, 4, 16, 16             # in_channels == out_channels == 4
    x = jax.random.normal(k_x, (N, C, H, W), jnp.float32)
    params = init_params(k_p, C, C)
    wbands, bvecs = prepare_params(params, W=W, N=N)   # one-time weight prep

    y = jax.block_until_ready(rcab_forward(x, wbands, bvecs))
    y_ref = rcab_reference(x, params)

    assert y.shape == (N, C, H, W)
    err = float(jnp.max(jnp.abs(y - y_ref)))
    # All-f32 kernel -> tight tolerance (review).  A bf16-weight variant (the
    # real-size MXU lever on v5e/v6e) would need a documented relaxation.
    assert jnp.allclose(y, y_ref, atol=1e-4, rtol=1e-4), \
        f"max abs diff {err}"

    print("KERNEL_OK")
</pallas_src>

<mosaic_0001>
module attributes {stable_mosaic.version = 11 : i64} {
  func.func @rcab_kernel(%arg0: memref<8x16x16xf32, #tpu.memory_space<vmem>>, %arg1: memref<4x3x128x128xf32, #tpu.memory_space<vmem>>, %arg2: memref<4x1x128xf32, #tpu.memory_space<vmem>>, %arg3: memref<8x16x16xf32, #tpu.memory_space<vmem>>, %arg4: memref<16x128xf32, #tpu.memory_space<vmem>>, %arg5: memref<18x128xf32, #tpu.memory_space<vmem>>) attributes {dimension_semantics = [], scalar_prefetch = 0 : i64, scratch_operands = 2 : i64, tpu.core_type = #tpu.core_type<tc>} {
    %c0 = arith.constant 0 : index
    %c0_0 = arith.constant 0 : index
    %c0_1 = arith.constant 0 : index
    %0 = vector.load %arg0[%c0, %c0_0, %c0_1] : memref<8x16x16xf32, #tpu.memory_space<vmem>>, vector<1x16x16xf32>
    %1 = vector.shape_cast %0 : vector<1x16x16xf32> to vector<16x16xf32>
    %c0_2 = arith.constant 0 : index
    %c0_3 = arith.constant 0 : index
    %2 = vector.load %arg4[%c0_2, %c0_3] : memref<16x128xf32, #tpu.memory_space<vmem>>, vector<16x16xf32>
    tpu.vector_store %arg4[%c0_2, %c0_3], %1 {strides = array<i32>} : memref<16x128xf32, #tpu.memory_space<vmem>>, vector<16x16xf32>,
    %c1 = arith.constant 1 : index
    %c0_4 = arith.constant 0 : index
    %c0_5 = arith.constant 0 : index
    %3 = vector.load %arg0[%c1, %c0_4, %c0_5] : memref<8x16x16xf32, #tpu.memory_space<vmem>>, vector<1x16x16xf32>
    %4 = vector.shape_cast %3 : vector<1x16x16xf32> to vector<16x16xf32>
    %c0_6 = arith.constant 0 : index
    %c16 = arith.constant 16 : index
    %5 = vector.load %arg4[%c0_6, %c16] : memref<16x128xf32, #tpu.memory_space<vmem>>, vector<16x16xf32>
    tpu.vector_store %arg4[%c0_6, %c16], %4 {strides = array<i32>} : memref<16x128xf32, #tpu.memory_space<vmem>>, vector<16x16xf32>,
    %c2 = arith.constant 2 : index
    %c0_7 = arith.constant 0 : index
    %c0_8 = arith.constant 0 : index
    %6 = vector.load %arg0[%c2, %c0_7, %c0_8] : memref<8x16x16xf32, #tpu.memory_space<vmem>>, vector<1x16x16xf32>
    %7 = vector.shape_cast %6 : vector<1x16x16xf32> to vector<16x16xf32>
    %c0_9 = arith.constant 0 : index
    %c32 = arith.constant 32 : index
    %8 = vector.load %arg4[%c0_9, %c32] : memref<16x128xf32, #tpu.memory_space<vmem>>, vector<16x16xf32>
    tpu.vector_store %arg4[%c0_9, %c32], %7 {strides = array<i32>} : memref<16x128xf32, #tpu.memory_space<vmem>>, vector<16x16xf32>,
    %c3 = arith.constant 3 : index
    %c0_10 = arith.constant 0 : index
    %c0_11 = arith.constant 0 : index
    %9 = vector.load %arg0[%c3, %c0_10, %c0_11] : memref<8x16x16xf32, #tpu.memory_space<vmem>>, vector<1x16x16xf32>
    %10 = vector.shape_cast %9 : vector<1x16x16xf32> to vector<16x16xf32>
    %c0_12 = arith.constant 0 : index
    %c48 = arith.constant 48 : index
    %11 = vector.load %arg4[%c0_12, %c48] : memref<16x128xf32, #tpu.memory_space<vmem>>, vector<16x16xf32>
    tpu.vector_store %arg4[%c0_12, %c48], %10 {strides = array<i32>} : memref<16x128xf32, #tpu.memory_space<vmem>>, vector<16x16xf32>,
    %c4 = arith.constant 4 : index
    %c0_13 = arith.constant 0 : index
    %c0_14 = arith.constant 0 : index
    %12 = vector.load %arg0[%c4, %c0_13, %c0_14] : memref<8x16x16xf32, #tpu.memory_space<vmem>>, vector<1x16x16xf32>
    %13 = vector.shape_cast %12 : vector<1x16x16xf32> to vector<16x16xf32>
    %c0_15 = arith.constant 0 : index
    %c64 = arith.constant 64 : index
    %14 = vector.load %arg4[%c0_15, %c64] : memref<16x128xf32, #tpu.memory_space<vmem>>, vector<16x16xf32>
    tpu.vector_store %arg4[%c0_15, %c64], %13 {strides = array<i32>} : memref<16x128xf32, #tpu.memory_space<vmem>>, vector<16x16xf32>,
    %c5 = arith.constant 5 : index
    %c0_16 = arith.constant 0 : index
    %c0_17 = arith.constant 0 : index
    %15 = vector.load %arg0[%c5, %c0_16, %c0_17] : memref<8x16x16xf32, #tpu.memory_space<vmem>>, vector<1x16x16xf32>
    %16 = vector.shape_cast %15 : vector<1x16x16xf32> to vector<16x16xf32>
    %c0_18 = arith.constant 0 : index
    %c80 = arith.constant 80 : index
    %17 = vector.load %arg4[%c0_18, %c80] : memref<16x128xf32, #tpu.memory_space<vmem>>, vector<16x16xf32>
    tpu.vector_store %arg4[%c0_18, %c80], %16 {strides = array<i32>} : memref<16x128xf32, #tpu.memory_space<vmem>>, vector<16x16xf32>,
    %c6 = arith.constant 6 : index
    %c0_19 = arith.constant 0 : index
    %c0_20 = arith.constant 0 : index
    %18 = vector.load %arg0[%c6, %c0_19, %c0_20] : memref<8x16x16xf32, #tpu.memory_space<vmem>>, vector<1x16x16xf32>
    %19 = vector.shape_cast %18 : vector<1x16x16xf32> to vector<16x16xf32>
    %c0_21 = arith.constant 0 : index
    %c96 = arith.constant 96 : index
    %20 = vector.load %arg4[%c0_21, %c96] : memref<16x128xf32, #tpu.memory_space<vmem>>, vector<16x16xf32>
    tpu.vector_store %arg4[%c0_21, %c96], %19 {strides = array<i32>} : memref<16x128xf32, #tpu.memory_space<vmem>>, vector<16x16xf32>,
    %c7 = arith.constant 7 : index
    %c0_22 = arith.constant 0 : index
    %c0_23 = arith.constant 0 : index
    %21 = vector.load %arg0[%c7, %c0_22, %c0_23] : memref<8x16x16xf32, #tpu.memory_space<vmem>>, vector<1x16x16xf32>
    %22 = vector.shape_cast %21 : vector<1x16x16xf32> to vector<16x16xf32>
    %c0_24 = arith.constant 0 : index
    %c112 = arith.constant 112 : index
    %23 = vector.load %arg4[%c0_24, %c112] : memref<16x128xf32, #tpu.memory_space<vmem>>, vector<16x16xf32>
    tpu.vector_store %arg4[%c0_24, %c112], %22 {strides = array<i32>} : memref<16x128xf32, #tpu.memory_space<vmem>>, vector<16x16xf32>,
    %cst = arith.constant 0.000000e+00 : f32
    %24 = vector.broadcast %cst : f32 to vector<1x128xf32>
    %c0_25 = arith.constant 0 : index
    %c0_26 = arith.constant 0 : index
    %25 = vector.load %arg5[%c0_25, %c0_26] : memref<18x128xf32, #tpu.memory_space<vmem>>, vector<1x128xf32>
    tpu.vector_store %arg5[%c0_25, %c0_26], %24 {strides = array<i32>} : memref<18x128xf32, #tpu.memory_space<vmem>>, vector<1x128xf32>,
    %c17 = arith.constant 17 : index
    %c0_27 = arith.constant 0 : index
    %26 = vector.load %arg5[%c17, %c0_27] : memref<18x128xf32, #tpu.memory_space<vmem>>, vector<1x128xf32>
    tpu.vector_store %arg5[%c17, %c0_27], %24 {strides = array<i32>} : memref<18x128xf32, #tpu.memory_space<vmem>>, vector<1x128xf32>,
    %c0_28 = arith.constant 0 : index
    %c0_29 = arith.constant 0 : index
    %27 = vector.load %arg4[%c0_28, %c0_29] : memref<16x128xf32, #tpu.memory_space<vmem>>, vector<16x128xf32>
    %c1_30 = arith.constant 1 : index
    %c0_31 = arith.constant 0 : index
    %28 = vector.load %arg5[%c1_30, %c0_31] : memref<18x128xf32, #tpu.memory_space<vmem>>, vector<16x128xf32>
    tpu.vector_store %arg5[%c1_30, %c0_31], %27 {strides = array<i32>} : memref<18x128xf32, #tpu.memory_space<vmem>>, vector<16x128xf32>,
    %c0_32 = arith.constant 0 : index
    %c0_33 = arith.constant 0 : index
    %29 = vector.load %arg5[%c0_32, %c0_33] : memref<18x128xf32, #tpu.memory_space<vmem>>, vector<16x128xf32>
    %c0_34 = arith.constant 0 : index
    %c0_35 = arith.constant 0 : index
    %c0_36 = arith.constant 0 : index
    %c0_37 = arith.constant 0 : index
    %30 = vector.load %arg1[%c0_34, %c0_35, %c0_36, %c0_37] : memref<4x3x128x128xf32, #tpu.memory_space<vmem>>, vector<1x1x128x128xf32>
    %31 = vector.shape_cast %30 : vector<1x1x128x128xf32> to vector<128x128xf32>
    %cst_38 = arith.constant dense<0.000000e+00> : vector<16x128xf32>
    %32 = tpu.matmul %29, %31, %cst_38 {dimension_numbers = #tpu.dot_dimension_numbers<[1], [0], [0], [1], [0, 0, 1, 1], [], []>} : vector<16x128xf32>, vector<128x128xf32>, vector<16x128xf32> -> vector<16x128xf32>
    %c1_39 = arith.constant 1 : index
    %c0_40 = arith.constant 0 : index
    %33 = vector.load %arg5[%c1_39, %c0_40] : memref<18x128xf32, #tpu.memory_space<vmem>>, vector<16x128xf32>
    %c0_41 = arith.constant 0 : index
    %c1_42 = arith.constant 1 : index
    %c0_43 = arith.constant 0 : index
    %c0_44 = arith.constant 0 : index
    %34 = vector.load %arg1[%c0_41, %c1_42, %c0_43, %c0_44] : memref<4x3x128x128xf32, #tpu.memory_space<vmem>>, vector<1x1x128x128xf32>
    %35 = vector.shape_cast %34 : vector<1x1x128x128xf32> to vector<128x128xf32>
    %cst_45 = arith.constant dense<0.000000e+00> : vector<16x128xf32>
    %36 = tpu.matmul %33, %35, %cst_45 {dimension_numbers = #tpu.dot_dimension_numbers<[1], [0], [0], [1], [0, 0, 1, 1], [], []>} : vector<16x128xf32>, vector<128x128xf32>, vector<16x128xf32> -> vector<16x128xf32>
    %37 = arith.addf %32, %36 : vector<16x128xf32>
    %c2_46 = arith.constant 2 : index
    %c0_47 = arith.constant 0 : index
    %38 = vector.load %arg5[%c2_46, %c0_47] : memref<18x128xf32, #tpu.memory_space<vmem>>, vector<16x128xf32>
    %c0_48 = arith.constant 0 : index
    %c2_49 = arith.constant 2 : index
    %c0_50 = arith.constant 0 : index
    %c0_51 = arith.constant 0 : index
    %39 = vector.load %arg1[%c0_48, %c2_49, %c0_50, %c0_51] : memref<4x3x128x128xf32, #tpu.memory_space<vmem>>, vector<1x1x128x128xf32>
    %40 = vector.shape_cast %39 : vector<1x1x128x128xf32> to vector<128x128xf32>
    %cst_52 = arith.constant dense<0.000000e+00> : vector<16x128xf32>
    %41 = tpu.matmul %38, %40, %cst_52 {dimension_numbers = #tpu.dot_dimension_numbers<[1], [0], [0], [1], [0, 0, 1, 1], [], []>} : vector<16x128xf32>, vector<128x128xf32>, vector<16x128xf32> -> vector<16x128xf32>
    %42 = arith.addf %37, %41 : vector<16x128xf32>
    %c0_53 = arith.constant 0 : index
    %c0_54 = arith.constant 0 : index
    %c0_55 = arith.constant 0 : index
    %43 = vector.load %arg2[%c0_53, %c0_54, %c0_55] : memref<4x1x128xf32, #tpu.memory_space<vmem>>, vector<1x1x128xf32>
    %44 = vector.shape_cast %43 : vector<1x1x128xf32> to vector<1x128xf32>
    %45 = vector.broadcast %44 : vector<1x128xf32> to vector<16x128xf32>
    %46 = arith.addf %42, %45 : vector<16x128xf32>
    %cst_56 = arith.constant 0.000000e+00 : f32
    %47 = vector.broadcast %cst_56 : f32 to vector<16x128xf32>
    %48 = arith.maximumf %46, %47 : vector<16x128xf32>
    %c1_57 = arith.constant 1 : index
    %c0_58 = arith.constant 0 : index
    %49 = vector.load %arg5[%c1_57, %c0_58] : memref<18x128xf32, #tpu.memory_space<vmem>>, vector<16x128xf32>
    tpu.vector_store %arg5[%c1_57, %c0_58], %48 {strides = array<i32>} : memref<18x128xf32, #tpu.memory_space<vmem>>, vector<16x128xf32>,
    %c0_59 = arith.constant 0 : index
    %c0_60 = arith.constant 0 : index
    %50 = vector.load %arg5[%c0_59, %c0_60] : memref<18x128xf32, #tpu.memory_space<vmem>>, vector<16x128xf32>
    %c1_61 = arith.constant 1 : index
    %c0_62 = arith.constant 0 : index
    %c0_63 = arith.constant 0 : index
    %c0_64 = arith.constant 0 : index
    %51 = vector.load %arg1[%c1_61, %c0_62, %c0_63, %c0_64] : memref<4x3x128x128xf32, #tpu.memory_space<vmem>>, vector<1x1x128x128xf32>
    %52 = vector.shape_cast %51 : vector<1x1x128x128xf32> to vector<128x128xf32>
    %cst_65 = arith.constant dense<0.000000e+00> : vector<16x128xf32>
    %53 = tpu.matmul %50, %52, %cst_65 {dimension_numbers = #tpu.dot_dimension_numbers<[1], [0], [0], [1], [0, 0, 1, 1], [], []>} : vector<16x128xf32>, vector<128x128xf32>, vector<16x128xf32> -> vector<16x128xf32>
    %c1_66 = arith.constant 1 : index
    %c0_67 = arith.constant 0 : index
    %54 = vector.load %arg5[%c1_66, %c0_67] : memref<18x128xf32, #tpu.memory_space<vmem>>, vector<16x128xf32>
    %c1_68 = arith.constant 1 : index
    %c1_69 = arith.constant 1 : index
    %c0_70 = arith.constant 0 : index
    %c0_71 = arith.constant 0 : index
    %55 = vector.load %arg1[%c1_68, %c1_69, %c0_70, %c0_71] : memref<4x3x128x128xf32, #tpu.memory_space<vmem>>, vector<1x1x128x128xf32>
    %56 = vector.shape_cast %55 : vector<1x1x128x128xf32> to vector<128x128xf32>
    %cst_72 = arith.constant dense<0.000000e+00> : vector<16x128xf32>
    %57 = tpu.matmul %54, %56, %cst_72 {dimension_numbers = #tpu.dot_dimension_numbers<[1], [0], [0], [1], [0, 0, 1, 1], [], []>} : vector<16x128xf32>, vector<128x128xf32>, vector<16x128xf32> -> vector<16x128xf32>
    %58 = arith.addf %53, %57 : vector<16x128xf32>
    %c2_73 = arith.constant 2 : index
    %c0_74 = arith.constant 0 : index
    %59 = vector.load %arg5[%c2_73, %c0_74] : memref<18x128xf32, #tpu.memory_space<vmem>>, vector<16x128xf32>
    %c1_75 = arith.constant 1 : index
    %c2_76 = arith.constant 2 : index
    %c0_77 = arith.constant 0 : index
    %c0_78 = arith.constant 0 : index
    %60 = vector.load %arg1[%c1_75, %c2_76, %c0_77, %c0_78] : memref<4x3x128x128xf32, #tpu.memory_space<vmem>>, vector<1x1x128x128xf32>
    %61 = vector.shape_cast %60 : vector<1x1x128x128xf32> to vector<128x128xf32>
    %cst_79 = arith.constant dense<0.000000e+00> : vector<16x128xf32>
    %62 = tpu.matmul %59, %61, %cst_79 {dimension_numbers = #tpu.dot_dimension_numbers<[1], [0], [0], [1], [0, 0, 1, 1], [], []>} : vector<16x128xf32>, vector<128x128xf32>, vector<16x128xf32> -> vector<16x128xf32>
    %63 = arith.addf %58, %62 : vector<16x128xf32>
    %c1_80 = arith.constant 1 : index
    %c0_81 = arith.constant 0 : index
    %c0_82 = arith.constant 0 : index
    %64 = vector.load %arg2[%c1_80, %c0_81, %c0_82] : memref<4x1x128xf32, #tpu.memory_space<vmem>>, vector<1x1x128xf32>
    %65 = vector.shape_cast %64 : vector<1x1x128xf32> to vector<1x128xf32>
    %66 = vector.broadcast %65 : vector<1x128xf32> to vector<16x128xf32>
    %67 = arith.addf %63, %66 : vector<16x128xf32>
    %68 = arith.negf %67 : vector<16x128xf32>
    %69 = math.exp %68 : vector<16x128xf32>
    %cst_83 = arith.constant 1.000000e+00 : f32
    %70 = vector.broadcast %cst_83 : f32 to vector<16x128xf32>
    %71 = arith.addf %70, %69 : vector<16x128xf32>
    %72 = arith.divf %70, %71 : vector<16x128xf32>
    %c1_84 = arith.constant 1 : index
    %c0_85 = arith.constant 0 : index
    %73 = vector.load %arg5[%c1_84, %c0_85] : memref<18x128xf32, #tpu.memory_space<vmem>>, vector<16x128xf32>
    tpu.vector_store %arg5[%c1_84, %c0_85], %72 {strides = array<i32>} : memref<18x128xf32, #tpu.memory_space<vmem>>, vector<16x128xf32>,
    %c0_86 = arith.constant 0 : index
    %c0_87 = arith.constant 0 : index
    %74 = vector.load %arg5[%c0_86, %c0_87] : memref<18x128xf32, #tpu.memory_space<vmem>>, vector<16x128xf32>
    %c2_88 = arith.constant 2 : index
    %c0_89 = arith.constant 0 : index
    %c0_90 = arith.constant 0 : index
    %c0_91 = arith.constant 0 : index
    %75 = vector.load %arg1[%c2_88, %c0_89, %c0_90, %c0_91] : memref<4x3x128x128xf32, #tpu.memory_space<vmem>>, vector<1x1x128x128xf32>
    %76 = vector.shape_cast %75 : vector<1x1x128x128xf32> to vector<128x128xf32>
    %cst_92 = arith.constant dense<0.000000e+00> : vector<16x128xf32>
    %77 = tpu.matmul %74, %76, %cst_92 {dimension_numbers = #tpu.dot_dimension_numbers<[1], [0], [0], [1], [0, 0, 1, 1], [], []>} : vector<16x128xf32>, vector<128x128xf32>, vector<16x128xf32> -> vector<16x128xf32>
    %c1_93 = arith.constant 1 : index
    %c0_94 = arith.constant 0 : index
    %78 = vector.load %arg5[%c1_93, %c0_94] : memref<18x128xf32, #tpu.memory_space<vmem>>, vector<16x128xf32>
    %c2_95 = arith.constant 2 : index
    %c1_96 = arith.constant 1 : index
    %c0_97 = arith.constant 0 : index
    %c0_98 = arith.constant 0 : index
    %79 = vector.load %arg1[%c2_95, %c1_96, %c0_97, %c0_98] : memref<4x3x128x128xf32, #tpu.memory_space<vmem>>, vector<1x1x128x128xf32>
    %80 = vector.shape_cast %79 : vector<1x1x128x128xf32> to vector<128x128xf32>
    %cst_99 = arith.constant dense<0.000000e+00> : vector<16x128xf32>
    %81 = tpu.matmul %78, %80, %cst_99 {dimension_numbers = #tpu.dot_dimension_numbers<[1], [0], [0], [1], [0, 0, 1, 1], [], []>} : vector<16x128xf32>, vector<128x128xf32>, vector<16x128xf32> -> vector<16x128xf32>
    %82 = arith.addf %77, %81 : vector<16x128xf32>
    %c2_100 = arith.constant 2 : index
    %c0_101 = arith.constant 0 : index
    %83 = vector.load %arg5[%c2_100, %c0_101] : memref<18x128xf32, #tpu.memory_space<vmem>>, vector<16x128xf32>
    %c2_102 = arith.constant 2 : index
    %c2_103 = arith.constant 2 : index
    %c0_104 = arith.constant 0 : index
    %c0_105 = arith.constant 0 : index
    %84 = vector.load %arg1[%c2_102, %c2_103, %c0_104, %c0_105] : memref<4x3x128x128xf32, #tpu.memory_space<vmem>>, vector<1x1x128x128xf32>
    %85 = vector.shape_cast %84 : vector<1x1x128x128xf32> to vector<128x128xf32>
    %cst_106 = arith.constant dense<0.000000e+00> : vector<16x128xf32>
    %86 = tpu.matmul %83, %85, %cst_106 {dimension_numbers = #tpu.dot_dimension_numbers<[1], [0], [0], [1], [0, 0, 1, 1], [], []>} : vector<16x128xf32>, vector<128x128xf32>, vector<16x128xf32> -> vector<16x128xf32>
    %87 = arith.addf %82, %86 : vector<16x128xf32>
    %c2_107 = arith.constant 2 : index
    %c0_108 = arith.constant 0 : index
    %c0_109 = arith.constant 0 : index
    %88 = vector.load %arg2[%c2_107, %c0_108, %c0_109] : memref<4x1x128xf32, #tpu.memory_space<vmem>>, vector<1x1x128xf32>
    %89 = vector.shape_cast %88 : vector<1x1x128xf32> to vector<1x128xf32>
    %90 = vector.broadcast %89 : vector<1x128xf32> to vector<16x128xf32>
    %91 = arith.addf %87, %90 : vector<16x128xf32>
    %cst_110 = arith.constant 0.000000e+00 : f32
    %92 = vector.broadcast %cst_110 : f32 to vector<16x128xf32>
    %93 = arith.maximumf %91, %92 : vector<16x128xf32>
    %c1_111 = arith.constant 1 : index
    %c0_112 = arith.constant 0 : index
    %94 = vector.load %arg5[%c1_111, %c0_112] : memref<18x128xf32, #tpu.memory_space<vmem>>, vector<16x128xf32>
    tpu.vector_store %arg5[%c1_111, %c0_112], %93 {strides = array<i32>} : memref<18x128xf32, #tpu.memory_space<vmem>>, vector<16x128xf32>,
    %c0_113 = arith.constant 0 : index
    %c0_114 = arith.constant 0 : index
    %95 = vector.load %arg5[%c0_113, %c0_114] : memref<18x128xf32, #tpu.memory_space<vmem>>, vector<16x128xf32>
    %c3_115 = arith.constant 3 : index
    %c0_116 = arith.constant 0 : index
    %c0_117 = arith.constant 0 : index
    %c0_118 = arith.constant 0 : index
    %96 = vector.load %arg1[%c3_115, %c0_116, %c0_117, %c0_118] : memref<4x3x128x128xf32, #tpu.memory_space<vmem>>, vector<1x1x128x128xf32>
    %97 = vector.shape_cast %96 : vector<1x1x128x128xf32> to vector<128x128xf32>
    %cst_119 = arith.constant dense<0.000000e+00> : vector<16x128xf32>
    %98 = tpu.matmul %95, %97, %cst_119 {dimension_numbers = #tpu.dot_dimension_numbers<[1], [0], [0], [1], [0, 0, 1, 1], [], []>} : vector<16x128xf32>, vector<128x128xf32>, vector<16x128xf32> -> vector<16x128xf32>
    %c1_120 = arith.constant 1 : index
    %c0_121 = arith.constant 0 : index
    %99 = vector.load %arg5[%c1_120, %c0_121] : memref<18x128xf32, #tpu.memory_space<vmem>>, vector<16x128xf32>
    %c3_122 = arith.constant 3 : index
    %c1_123 = arith.constant 1 : index
    %c0_124 = arith.constant 0 : index
    %c0_125 = arith.constant 0 : index
    %100 = vector.load %arg1[%c3_122, %c1_123, %c0_124, %c0_125] : memref<4x3x128x128xf32, #tpu.memory_space<vmem>>, vector<1x1x128x128xf32>
    %101 = vector.shape_cast %100 : vector<1x1x128x128xf32> to vector<128x128xf32>
    %cst_126 = arith.constant dense<0.000000e+00> : vector<16x128xf32>
    %102 = tpu.matmul %99, %101, %cst_126 {dimension_numbers = #tpu.dot_dimension_numbers<[1], [0], [0], [1], [0, 0, 1, 1], [], []>} : vector<16x128xf32>, vector<128x128xf32>, vector<16x128xf32> -> vector<16x128xf32>
    %103 = arith.addf %98, %102 : vector<16x128xf32>
    %c2_127 = arith.constant 2 : index
    %c0_128 = arith.constant 0 : index
    %104 = vector.load %arg5[%c2_127, %c0_128] : memref<18x128xf32, #tpu.memory_space<vmem>>, vector<16x128xf32>
    %c3_129 = arith.constant 3 : index
    %c2_130 = arith.constant 2 : index
    %c0_131 = arith.constant 0 : index
    %c0_132 = arith.constant 0 : index
    %105 = vector.load %arg1[%c3_129, %c2_130, %c0_131, %c0_132] : memref<4x3x128x128xf32, #tpu.memory_space<vmem>>, vector<1x1x128x128xf32>
    %106 = vector.shape_cast %105 : vector<1x1x128x128xf32> to vector<128x128xf32>
    %cst_133 = arith.constant dense<0.000000e+00> : vector<16x128xf32>
    %107 = tpu.matmul %104, %106, %cst_133 {dimension_numbers = #tpu.dot_dimension_numbers<[1], [0], [0], [1], [0, 0, 1, 1], [], []>} : vector<16x128xf32>, vector<128x128xf32>, vector<16x128xf32> -> vector<16x128xf32>
    %108 = arith.addf %103, %107 : vector<16x128xf32>
    %c3_134 = arith.constant 3 : index
    %c0_135 = arith.constant 0 : index
    %c0_136 = arith.constant 0 : index
    %109 = vector.load %arg2[%c3_134, %c0_135, %c0_136] : memref<4x1x128xf32, #tpu.memory_space<vmem>>, vector<1x1x128xf32>
    %110 = vector.shape_cast %109 : vector<1x1x128xf32> to vector<1x128xf32>
    %111 = vector.broadcast %110 : vector<1x128xf32> to vector<16x128xf32>
    %112 = arith.addf %108, %111 : vector<16x128xf32>
    %113 = arith.negf %112 : vector<16x128xf32>
    %114 = math.exp %113 : vector<16x128xf32>
    %cst_137 = arith.constant 1.000000e+00 : f32
    %115 = vector.broadcast %cst_137 : f32 to vector<16x128xf32>
    %116 = arith.addf %115, %114 : vector<16x128xf32>
    %117 = arith.divf %115, %116 : vector<16x128xf32>
    %118 = arith.mulf %117, %67 : vector<16x128xf32>
    %119 = arith.addf %27, %118 : vector<16x128xf32>
    %120 = vector.extract_strided_slice %119 {offsets = [0, 0], sizes = [16, 16], strides = [1, 1]} : vector<16x128xf32> to vector<16x16xf32>
    %c0_138 = arith.constant 0 : index
    %c0_139 = arith.constant 0 : index
    %c0_140 = arith.constant 0 : index
    %121 = vector.load %arg3[%c0_138, %c0_139, %c0_140] : memref<8x16x16xf32, #tpu.memory_space<vmem>>, vector<1x16x16xf32>
    %122 = vector.shape_cast %121 : vector<1x16x16xf32> to vector<16x16xf32>
    %123 = vector.shape_cast %120 : vector<16x16xf32> to vector<1x16x16xf32>
    tpu.vector_store %arg3[%c0_138, %c0_139, %c0_140], %123 {strides = array<i32>} : memref<8x16x16xf32, #tpu.memory_space<vmem>>, vector<1x16x16xf32>,
    %124 = vector.extract_strided_slice %119 {offsets = [0, 16], sizes = [16, 16], strides = [1, 1]} : vector<16x128xf32> to vector<16x16xf32>
    %c1_141 = arith.constant 1 : index
    %c0_142 = arith.constant 0 : index
    %c0_143 = arith.constant 0 : index
    %125 = vector.load %arg3[%c1_141, %c0_142, %c0_143] : memref<8x16x16xf32, #tpu.memory_space<vmem>>, vector<1x16x16xf32>
    %126 = vector.shape_cast %125 : vector<1x16x16xf32> to vector<16x16xf32>
    %127 = vector.shape_cast %124 : vector<16x16xf32> to vector<1x16x16xf32>
    tpu.vector_store %arg3[%c1_141, %c0_142, %c0_143], %127 {strides = array<i32>} : memref<8x16x16xf32, #tpu.memory_space<vmem>>, vector<1x16x16xf32>,
    %128 = vector.extract_strided_slice %119 {offsets = [0, 32], sizes = [16, 16], strides = [1, 1]} : vector<16x128xf32> to vector<16x16xf32>
    %c2_144 = arith.constant 2 : index
    %c0_145 = arith.constant 0 : index
    %c0_146 = arith.constant 0 : index
    %129 = vector.load %arg3[%c2_144, %c0_145, %c0_146] : memref<8x16x16xf32, #tpu.memory_space<vmem>>, vector<1x16x16xf32>
    %130 = vector.shape_cast %129 : vector<1x16x16xf32> to vector<16x16xf32>
    %131 = vector.shape_cast %128 : vector<16x16xf32> to vector<1x16x16xf32>
    tpu.vector_store %arg3[%c2_144, %c0_145, %c0_146], %131 {strides = array<i32>} : memref<8x16x16xf32, #tpu.memory_space<vmem>>, vector<1x16x16xf32>,
    %132 = vector.extract_strided_slice %119 {offsets = [0, 48], sizes = [16, 16], strides = [1, 1]} : vector<16x128xf32> to vector<16x16xf32>
    %c3_147 = arith.constant 3 : index
    %c0_148 = arith.constant 0 : index
    %c0_149 = arith.constant 0 : index
    %133 = vector.load %arg3[%c3_147, %c0_148, %c0_149] : memref<8x16x16xf32, #tpu.memory_space<vmem>>, vector<1x16x16xf32>
    %134 = vector.shape_cast %133 : vector<1x16x16xf32> to vector<16x16xf32>
    %135 = vector.shape_cast %132 : vector<16x16xf32> to vector<1x16x16xf32>
    tpu.vector_store %arg3[%c3_147, %c0_148, %c0_149], %135 {strides = array<i32>} : memref<8x16x16xf32, #tpu.memory_space<vmem>>, vector<1x16x16xf32>,
    %136 = vector.extract_strided_slice %119 {offsets = [0, 64], sizes = [16, 16], strides = [1, 1]} : vector<16x128xf32> to vector<16x16xf32>
    %c4_150 = arith.constant 4 : index
    %c0_151 = arith.constant 0 : index
    %c0_152 = arith.constant 0 : index
    %137 = vector.load %arg3[%c4_150, %c0_151, %c0_152] : memref<8x16x16xf32, #tpu.memory_space<vmem>>, vector<1x16x16xf32>
    %138 = vector.shape_cast %137 : vector<1x16x16xf32> to vector<16x16xf32>
    %139 = vector.shape_cast %136 : vector<16x16xf32> to vector<1x16x16xf32>
    tpu.vector_store %arg3[%c4_150, %c0_151, %c0_152], %139 {strides = array<i32>} : memref<8x16x16xf32, #tpu.memory_space<vmem>>, vector<1x16x16xf32>,
    %140 = vector.extract_strided_slice %119 {offsets = [0, 80], sizes = [16, 16], strides = [1, 1]} : vector<16x128xf32> to vector<16x16xf32>
    %c5_153 = arith.constant 5 : index
    %c0_154 = arith.constant 0 : index
    %c0_155 = arith.constant 0 : index
    %141 = vector.load %arg3[%c5_153, %c0_154, %c0_155] : memref<8x16x16xf32, #tpu.memory_space<vmem>>, vector<1x16x16xf32>
    %142 = vector.shape_cast %141 : vector<1x16x16xf32> to vector<16x16xf32>
    %143 = vector.shape_cast %140 : vector<16x16xf32> to vector<1x16x16xf32>
    tpu.vector_store %arg3[%c5_153, %c0_154, %c0_155], %143 {strides = array<i32>} : memref<8x16x16xf32, #tpu.memory_space<vmem>>, vector<1x16x16xf32>,
    %144 = vector.extract_strided_slice %119 {offsets = [0, 96], sizes = [16, 16], strides = [1, 1]} : vector<16x128xf32> to vector<16x16xf32>
    %c6_156 = arith.constant 6 : index
    %c0_157 = arith.constant 0 : index
    %c0_158 = arith.constant 0 : index
    %145 = vector.load %arg3[%c6_156, %c0_157, %c0_158] : memref<8x16x16xf32, #tpu.memory_space<vmem>>, vector<1x16x16xf32>
    %146 = vector.shape_cast %145 : vector<1x16x16xf32> to vector<16x16xf32>
    %147 = vector.shape_cast %144 : vector<16x16xf32> to vector<1x16x16xf32>
    tpu.vector_store %arg3[%c6_156, %c0_157, %c0_158], %147 {strides = array<i32>} : memref<8x16x16xf32, #tpu.memory_space<vmem>>, vector<1x16x16xf32>,
    %148 = vector.extract_strided_slice %119 {offsets = [0, 112], sizes = [16, 16], strides = [1, 1]} : vector<16x128xf32> to vector<16x16xf32>
    %c7_159 = arith.constant 7 : index
    %c0_160 = arith.constant 0 : index
    %c0_161 = arith.constant 0 : index
    %149 = vector.load %arg3[%c7_159, %c0_160, %c0_161] : memref<8x16x16xf32, #tpu.memory_space<vmem>>, vector<1x16x16xf32>
    %150 = vector.shape_cast %149 : vector<1x16x16xf32> to vector<16x16xf32>
    %151 = vector.shape_cast %148 : vector<16x16xf32> to vector<1x16x16xf32>
    tpu.vector_store %arg3[%c7_159, %c0_160, %c0_161], %151 {strides = array<i32>} : memref<8x16x16xf32, #tpu.memory_space<vmem>>, vector<1x16x16xf32>,
    return
  }
}

</mosaic_0001>

<bundles_post_ra>
// kernel: rcab_forward.1
= control target key start
LH: loop header
LB: loop body
LE: loop exit
PB: predicated region body
PF: predicated region fallthrough
CT: control target
= control target key end

     0   :  { %8 = vsyncpa [#allocation5], 0  ;;  %s2755_s0 = inlined_call_operand.hbm [shape: f32[8,16,16], index: 0, kind: input, shape index: {}]   ;;  %s2756_s1 = inlined_call_operand.hbm [shape: f32[4,3,128,128], index: 1, kind: input, shape index: {}]   ;;  %s2757_s2 = inlined_call_operand.vmem [shape: f32[4,1,128], index: 2, kind: input, shape index: {}]   ;;  %s2758_s3 = inlined_call_operand.hbm [shape: f32[8,16,16], index: 3, kind: output, shape index: {}]  }
   0x1   :  { %9 = vsyncpa [#allocation8], 0 }
   0x2   :  { %10 = vsyncpa [#allocation6], 0  ;;  %s2597_s12 = smov [#allocation4]   ;;  %s2525_s16 = scalar_lea.hbm %s2755_s0, 2048 }
   0x3   :  { %s16_s13 = sshll.u32 %s2597_s12, 4  ;;  %p2526_p0 = scmp.ne.s32.totalorder %s2755_s0, %s2525_s16  ;;  %s17_s13 = int_to_ptr.vmem [resolvable:$true] %s16_s13 }
   0x4   :  { %p2529_p1 = scmp.lt.u32.totalorder %s2525_s16, %s2755_s0 }
   0x6   :  { %p2531_p2 = pnand %p2529_p1, %p2526_p0 }
   0x8   :  { %2534 = shalt.err (!%p2531_p2)
}
   0x9   :  { %s2535_s21 = scalar_lea.vmem %s17_s13, 2048  ;;  %p2540_p4 = scmp.lt.s32.totalorder %s17_s13, %s17_s13 }
   0xa   :  { %p2536_p3 = scmp.ne.s32.totalorder %s17_s13, %s2535_s21  ;;  %p2541_p5 = scmp.lt.s32.totalorder %s2535_s21, %s2535_s21 }
   0xc   :  { %p2542_p6 = por %p2541_p5, %p2540_p4 }
   0xe   :  { %p2543_p7 = pnand %p2542_p6, %p2536_p3 }
  0x10   :  { %2546 = shalt.err (!%p2543_p7)
}
  0x11   :  { %s2598_s22 = smov 128   ;;  %s2599_s23 = smov 8  }
  0x12   :  { %22 = dma.hbm_to_vmem [thread:$0]  %s2755_s0, 2048, %s17_s13, [#allocation5], %s2598_s22, %s2598_s22, %s2599_s23  }
  0x13   :  { %s2600_s26 = smov [#allocation7]   ;;  %s2547_s30 = scalar_lea.hbm %s2756_s1, 24576 }
  0x14   :  { %s28_s27 = sshll.u32 %s2600_s26, 4  ;;  %p2548_p8 = scmp.ne.s32.totalorder %s2756_s1, %s2547_s30  ;;  %s29_s27 = int_to_ptr.vmem [resolvable:$true] %s28_s27 }
  0x15   :  { %p2551_p9 = scmp.lt.u32.totalorder %s2547_s30, %s2756_s1 }
  0x17   :  { %p2553_p10 = pnand %p2551_p9, %p2548_p8 }
  0x19   :  { %2556 = shalt.err (!%p2553_p10)
}
  0x1a   :  { %s2557_s8 = scalar_lea.vmem %s29_s27, 24576  ;;  %p2562_p12 = scmp.lt.s32.totalorder %s29_s27, %s29_s27 }
  0x1b   :  { %p2558_p11 = scmp.ne.s32.totalorder %s29_s27, %s2557_s8  ;;  %p2563_p13 = scmp.lt.s32.totalorder %s2557_s8, %s2557_s8 }
  0x1d   :  { %p2564_p0 = por %p2563_p13, %p2562_p12 }
  0x1f   :  { %p2565_p1 = pnand %p2564_p0, %p2558_p11 }
  0x21   :  { %2568 = shalt.err (!%p2565_p1)
}
  0x22   :  { %34 = dma.hbm_to_vmem [thread:$0]  %s2756_s1, 24576, %s29_s27, [#allocation8], %s2598_s22, %s2598_s22, %s2599_s23  }
  0x23   :  { %2591 = dma.done.wait [#allocation5], 2048  }
  0x24   :  { %2592 = vsyncadd [#allocation5], 4294965248 }
  0x25   :  { %2593 = dma.done.wait [#allocation8], 24576  }
  0x26   :  { %2594 = vsyncadd [#allocation8], 4294942720  ;;  %v63_v0 = vld [vmem:[#allocation4 + $0x20] sm:$0xff]  ;;  %v49_v1 = vld [vmem:[#allocation4 + $0x10] sm:$0xff]  ;;  %s2601_s10 = smov 32   ;;  %s2602_s11 = smov 16  }
  0x27   :  { %67 = vrot.lane.b32.xlu1 %v63_v0, %s2601_s10  ;;  %53 = vrot.lane.b32.xlu0 %v49_v1, %s2602_s11  ;;  %v64_v2 = vld [vmem:[#allocation4 + $0x28] sm:$0xff]  ;;  %v50_v3 = vld [vmem:[#allocation4 + $0x18] sm:$0xff]  ;;  %vm45_vm0 = vcmask 130048   ;;  %v43_v5 = vld [vmem:[#allocation4] sm:$0xff]  ;;  %s2603_s1 = smov 48   ;;  %s2604_s12 = smov 64  }
  0x28   :  { %v78_v4 = vld [vmem:[#allocation4 + $0x38] sm:$0xff]  ;;  %46 = vst.msk [vmem:[#allocation2] sm:$0xff] %vm45_vm0, %v43_v5  ;;  %v44_v6 = vld [vmem:[#allocation4 + $0x8] sm:$0xff]  ;;  %v173_v7 = vld [vmem:[#allocation7 + $0x80] sm:$0xff]  ;;  %s2605_s13 = smov 80   ;;  %s2606_s14 = smov 96  }
  0x29   :  { %v174_v8 = vld [vmem:[#allocation7 + $0x88] sm:$0xff]  ;;  %v77_v9 = vld [vmem:[#allocation4 + $0x30] sm:$0xff]  ;;  %47 = vst.msk [vmem:[#allocation2 + $0x8] sm:$0xff] %vm45_vm0, %v44_v6  ;;  %v176_v12 = vld [vmem:[#allocation7 + $0x98] sm:$0xff]  ;;  %v2607_v31 = vmov 0.0   ;;  %s2608_s15 = smov 112  }
  0x2a   :  { %v2096_v10 = vpack.c.bf16 %v174_v8, %v173_v7  ;;  %v175_v11 = vld [vmem:[#allocation7 + $0x90] sm:$0xff]  ;;  %v177_v14 = vld [vmem:[#allocation7 + $0xa0] sm:$0xff]  ;;  %v178_v15 = vld [vmem:[#allocation7 + $0xa8] sm:$0xff]  ;;  %146 = vst [vmem:[#allocation3] sm:$0x1] %v2607_v31  ;;  %vm59_vm1 = vcmask 261248  }
  0x2b   :  { %69 = vrot.lane.b32.xlu1 %v64_v2, %s2601_s10  ;;  %55 = vrot.lane.b32.xlu0 %v50_v3, %s2602_s11  ;;  %v2100_v13 = vpack.c.bf16 %v176_v12, %v175_v11  ;;  %v92_v16 = vld [vmem:[#allocation4 + $0x48] sm:$0xff]  ;;  %v91_v17 = vld [vmem:[#allocation4 + $0x40] sm:$0xff]  ;;  %v2104_v18 = vpack.c.bf16 %v178_v15, %v177_v14  ;;  %v179_v19 = vld [vmem:[#allocation7 + $0xb0] sm:$0xff]  ;;  %147 = vst [vmem:[#allocation3 + $0x11] sm:$0x1] %v2607_v31  ;;  %vm73_vm2 = vcmask 392448  }
  0x2c   :  { %2097 = vmatprep.subr.bf16.mxu0 %v2096_v10  ;;  %v180_v20 = vld [vmem:[#allocation7 + $0xb8] sm:$0xff]  ;;  %v105_v22 = vld [vmem:[#allocation4 + $0x50] sm:$0xff]  ;;  %v181_v24 = vld [vmem:[#allocation7 + $0xc0] sm:$0xff]  ;;  %vm87_vm3 = vcmask 523648   ;;  %vm101_vm4 = vcmask 654848   ;;  %vm115_vm5 = vcmask 786048  }
  0x2d   :  { %2099 = vmatpush3.bf16.msra.mxu0 %v2096_v10  ;;  %v106_v21 = vld [vmem:[#allocation4 + $0x58] sm:$0xff]  ;;  %v2108_v23 = vpack.c.bf16 %v180_v20, %v179_v19  ;;  %v182_v25 = vld [vmem:[#allocation7 + $0xc8] sm:$0xff]  ;;  %v119_v27 = vld [vmem:[#allocation4 + $0x60] sm:$0xff]  ;;  %vm129_vm6 = vcmask 917248   ;;  %vm143_vm7 = vcmask 1048448  }
  0x2e   :  { %2101 = vmatprep.subr.bf16.mxu0 %v2100_v13  ;;  %v120_v26 = vld [vmem:[#allocation4 + $0x68] sm:$0xff]  ;;  %v2112_v28 = vpack.c.bf16 %v182_v25, %v181_v24  ;;  %v183_v29 = vld [vmem:[#allocation7 + $0xd0] sm:$0xff]  ;;  %v184_v30 = vld [vmem:[#allocation7 + $0xd8] sm:$0xff] }
  0x2f   :  { %83 = vrot.lane.b32.xlu1 %v78_v4, %s2603_s1  ;;  %81 = vrot.lane.b32.xlu0 %v77_v9, %s2603_s1  ;;  %v134_v32 = vld [vmem:[#allocation4 + $0x78] sm:$0xff]  ;;  %v133_v33 = vld [vmem:[#allocation4 + $0x70] sm:$0xff]  ;;  %v2116_v34 = vpack.c.bf16 %v184_v30, %v183_v29  ;;  %v185_v35 = vld [vmem:[#allocation7 + $0xe0] sm:$0xff] }
  0x30   :  { %v186_v36 = vld [vmem:[#allocation7 + $0xe8] sm:$0xff]  ;;  %v187_v38 = vld [vmem:[#allocation7 + $0xf0] sm:$0xff]  ;;  %v188_v39 = vld [vmem:[#allocation7 + $0xf8] sm:$0xff] }
  0x31   :  { %2103 = vmatpush3.bf16.msra.mxu0 %v2100_v13  ;;  %v2120_v37 = vpack.c.bf16 %v186_v36, %v185_v35  ;;  %v2124_v40 = vpack.c.bf16 %v188_v39, %v187_v38  ;;  %v154_v41 = vld [vmem:[#allocation7] sm:$0xff]  ;;  %v155_v42 = vld [vmem:[#allocation7 + $0x8] sm:$0xff]  ;;  %v472_v46 = vld [vmem:[#allocation7 + $0x210] sm:$0xff] }
  0x32   :  { %2105 = vmatprep.subr.bf16.mxu0 %v2104_v18  ;;  %v2676_v43 = vpack.c.bf16 %v155_v42, %v154_v41  ;;  %v470_v44 = vld [vmem:[#allocation7 + $0x200] sm:$0xff]  ;;  %v471_v45 = vld [vmem:[#allocation7 + $0x208] sm:$0xff]  ;;  %v473_v48 = vld [vmem:[#allocation7 + $0x218] sm:$0xff] }
  0x33   :  { %97 = vrot.lane.b32.xlu1 %v92_v16, %s2604_s12  ;;  %95 = vrot.lane.b32.xlu0 %v91_v17, %s2604_s12  ;;  %v2192_v47 = vpack.c.bf16 %v471_v45, %v470_v44  ;;  %v2196_v49 = vpack.c.bf16 %v473_v48, %v472_v46  ;;  %v474_v50 = vld [vmem:[#allocation7 + $0x220] sm:$0xff]  ;;  %v475_v51 = vld [vmem:[#allocation7 + $0x228] sm:$0xff]  ;;  %v476_v53 = vld [vmem:[#allocation7 + $0x230] sm:$0xff] }
  0x34   :  { %v2200_v52 = vpack.c.bf16 %v475_v51, %v474_v50  ;;  %v477_v54 = vld [vmem:[#allocation7 + $0x238] sm:$0xff]  ;;  %v478_v56 = vld [vmem:[#allocation7 + $0x240] sm:$0xff]  ;;  %v479_v57 = vld [vmem:[#allocation7 + $0x248] sm:$0xff] }
  0x35   :  { %2107 = vmatpush3.bf16.msra.mxu0 %v2104_v18  ;;  %2193 = vmatprep.subr.bf16.mxu1 %v2192_v47  ;;  %v2204_v55 = vpack.c.bf16 %v477_v54, %v476_v53  ;;  %v2208_v58 = vpack.c.bf16 %v479_v57, %v478_v56  ;;  %v156_v9 = vld [vmem:[#allocation7 + $0x10] sm:$0xff]  ;;  %v157_v10 = vld [vmem:[#allocation7 + $0x18] sm:$0xff]  ;;  %v158_v14 = vld [vmem:[#allocation7 + $0x20] sm:$0xff] }
  0x36   :  { %2109 = vmatprep.subr.bf16.mxu0 %v2108_v23  ;;  %2195 = vmatpush3.bf16.msra.mxu1 %v2192_v47  ;;  %v2132_v13 = vpack.c.bf16 %v157_v10, %v156_v9  ;;  %v159_v15 = vld [vmem:[#allocation7 + $0x28] sm:$0xff]  ;;  %v160_v17 = vld [vmem:[#allocation7 + $0x30] sm:$0xff]  ;;  %v161_v18 = vld [vmem:[#allocation7 + $0x38] sm:$0xff] }
  0x37   :  { %111 = vrot.lane.b32.xlu1 %v106_v21, %s2605_s13  ;;  %109 = vrot.lane.b32.xlu0 %v105_v22, %s2605_s13  ;;  %v2136_v16 = vpack.c.bf16 %v159_v15, %v158_v14  ;;  %v2140_v20 = vpack.c.bf16 %v161_v18, %v160_v17  ;;  %v162_v21 = vld [vmem:[#allocation7 + $0x40] sm:$0xff]  ;;  %v163_v22 = vld [vmem:[#allocation7 + $0x48] sm:$0xff]  ;;  %v164_v24 = vld [vmem:[#allocation7 + $0x50] sm:$0xff] }
  0x38   :  { %2197 = vmatprep.subr.bf16.mxu1 %v2196_v49  ;;  %v165_v25 = vld [vmem:[#allocation7 + $0x58] sm:$0xff]  ;;  %v168_v30 = vld [vmem:[#allocation7 + $0x70] sm:$0xff]  ;;  %v347_v41 = vld [vmem:[#allocation7 + $0x128] sm:$0xff] }
  0x39   :  { %2111 = vmatpush3.bf16.msra.mxu0 %v2108_v23  ;;  %v2144_v23 = vpack.c.bf16 %v163_v22, %v162_v21  ;;  %v169_v31 = vld [vmem:[#allocation7 + $0x78] sm:$0xff]  ;;  %v344_v36 = vld [vmem:[#allocation7 + $0x110] sm:$0xff]  ;;  %v350_v47 = vld [vmem:[#allocation7 + $0x140] sm:$0xff] }
  0x3a   :  { %2113 = vmatprep.subr.bf16.mxu0 %v2112_v28  ;;  %2199 = vmatpush3.bf16.msra.mxu1 %v2196_v49  ;;  %v348_v44 = vld [vmem:[#allocation7 + $0x130] sm:$0xff]  ;;  %v349_v45 = vld [vmem:[#allocation7 + $0x138] sm:$0xff]  ;;  %v351_v48 = vld [vmem:[#allocation7 + $0x148] sm:$0xff] }
  0x3b   :  { %125 = vrot.lane.b32.xlu1 %v120_v26, %s2606_s14  ;;  %123 = vrot.lane.b32.xlu0 %v119_v27, %s2606_s14  ;;  %v2148_v26 = vpack.c.bf16 %v165_v25, %v164_v24  ;;  %v166_v27 = vld [vmem:[#allocation7 + $0x60] sm:$0xff]  ;;  %v2172_v46 = vpack.c.bf16 %v349_v45, %v348_v44  ;;  %v2176_v49 = vpack.c.bf16 %v351_v48, %v350_v47  ;;  %v352_v50 = vld [vmem:[#allocation7 + $0x150] sm:$0xff]  ;;  %v353_v51 = vld [vmem:[#allocation7 + $0x158] sm:$0xff] }
  0x3c   :  { %2201 = vmatprep.subr.bf16.mxu1 %v2200_v52  ;;  %v354_v53 = vld [vmem:[#allocation7 + $0x160] sm:$0xff]  ;;  %v355_v54 = vld [vmem:[#allocation7 + $0x168] sm:$0xff]  ;;  %v356_v56 = vld [vmem:[#allocation7 + $0x170] sm:$0xff] }
  0x3d   :  { %2115 = vmatpush3.bf16.msra.mxu0 %v2112_v28  ;;  %v167_v28 = vld [vmem:[#allocation7 + $0x68] sm:$0xff]  ;;  %v357_v57 = vld [vmem:[#allocation7 + $0x178] sm:$0xff]  ;;  %v453_v15 = vld [vmem:[#allocation7 + $0x190] sm:$0xff] }
  0x3e   :  { %2117 = vmatprep.subr.bf16.mxu0 %v2116_v34  ;;  %2203 = vmatpush3.bf16.msra.mxu1 %v2200_v52  ;;  %v2152_v29 = vpack.c.bf16 %v167_v28, %v166_v27  ;;  %v2180_v52 = vpack.c.bf16 %v353_v51, %v352_v50  ;;  %v456_v21 = vld [vmem:[#allocation7 + $0x1a8] sm:$0xff]  ;;  %v458_v24 = vld [vmem:[#allocation7 + $0x1b8] sm:$0xff]  ;;  %v459_v27 = vld [vmem:[#allocation7 + $0x1c0] sm:$0xff] }
  0x3f   :  { %139 = vrot.lane.b32.xlu1 %v134_v32, %s2608_s15  ;;  %137 = vrot.lane.b32.xlu0 %v133_v33, %s2608_s15  ;;  %v2156_v32 = vpack.c.bf16 %v169_v31, %v168_v30  ;;  %v342_v33 = vld [vmem:[#allocation7 + $0x100] sm:$0xff]  ;;  %v460_v28 = vld [vmem:[#allocation7 + $0x1c8] sm:$0xff]  ;;  %v461_v30 = vld [vmem:[#allocation7 + $0x1d0] sm:$0xff] }
  0x40   :  { %2205 = vmatprep.subr.bf16.mxu1 %v2204_v55  ;;  %v462_v31 = vld [vmem:[#allocation7 + $0x1d8] sm:$0xff]  ;;  %v644_v47 = vld [vmem:[#allocation7 + $0x2a8] sm:$0xff]  ;;  %v645_v50 = vld [vmem:[#allocation7 + $0x2b0] sm:$0xff] }
  0x41   :  { %2119 = vmatpush3.bf16.msra.mxu0 %v2116_v34  ;;  %v343_v34 = vld [vmem:[#allocation7 + $0x108] sm:$0xff]  ;;  %v646_v51 = vld [vmem:[#allocation7 + $0x2b8] sm:$0xff] }
  0x42   :  { %2121 = vmatprep.subr.bf16.mxu0 %v2120_v37  ;;  %2207 = vmatpush3.bf16.msra.mxu1 %v2204_v55  ;;  %v2160_v35 = vpack.c.bf16 %v343_v34, %v342_v33  ;;  %v2184_v55 = vpack.c.bf16 %v355_v54, %v354_v53  ;;  %v463_v33 = vld [vmem:[#allocation7 + $0x1e0] sm:$0xff]  ;;  %v464_v34 = vld [vmem:[#allocation7 + $0x1e8] sm:$0xff] }
  0x43   :  { %2209 = vmatprep.subr.bf16.mxu1 %v2208_v58  ;;  %v647_v53 = vld [vmem:[#allocation7 + $0x2c0] sm:$0xff]  ;;  %v648_v54 = vld [vmem:[#allocation7 + $0x2c8] sm:$0xff] }
  0x45   :  { %2123 = vmatpush3.bf16.msra.mxu0 %v2120_v37  ;;  %v345_v37 = vld [vmem:[#allocation7 + $0x118] sm:$0xff] }
  0x46   :  { %2125 = vmatprep.subr.bf16.mxu0 %v2124_v40  ;;  %2211 = vmatpush3.bf16.msra.mxu1 %v2208_v58  ;;  %v2164_v38 = vpack.c.bf16 %v345_v37, %v344_v36  ;;  %v2188_v58 = vpack.c.bf16 %v357_v57, %v356_v56  ;;  %v465_v36 = vld [vmem:[#allocation7 + $0x1f0] sm:$0xff]  ;;  %v466_v37 = vld [vmem:[#allocation7 + $0x1f8] sm:$0xff] }
  0x47   :  { %v649_v56 = vld [vmem:[#allocation7 + $0x2d0] sm:$0xff]  ;;  %v650_v57 = vld [vmem:[#allocation7 + $0x2d8] sm:$0xff] }
  0x49   :  { %2127 = vmatpush3.bf16.msra.mxu0 %v2124_v40  ;;  %v346_v40 = vld [vmem:[#allocation7 + $0x120] sm:$0xff] }
  0x4a   :  { %2129 = vmatprep.subr.bf16.mxu0 %v2676_v43 }
  0x99   :  { %v68_v59 = vpop.permute.xlu1 %67  ;;  %v54_v60 = vpop.permute.xlu0 %53 }
  0x9a   :  { %60 = vst.msk [vmem:[#allocation2] sm:$0xff] %vm59_vm1, %v54_v60  ;;  %v480_v60 = vld [vmem:[#allocation7 + $0x250] sm:$0xff] }
  0x9b   :  { %74 = vst.msk [vmem:[#allocation2] sm:$0xff] %vm73_vm2, %v68_v59 }
  0x9d   :  { %v70_v61 = vpop.permute.xlu1 %69  ;;  %v56_v62 = vpop.permute.xlu0 %55 }
  0x9e   :  { %61 = vst.msk [vmem:[#allocation2 + $0x8] sm:$0xff] %vm59_vm1, %v56_v62 }
  0x9f   :  { %75 = vst.msk [vmem:[#allocation2 + $0x8] sm:$0xff] %vm73_vm2, %v70_v61  ;;  %v481_v61 = vld [vmem:[#allocation7 + $0x258] sm:$0xff] }
  0xa0   :  { %v2212_v62 = vpack.c.bf16 %v481_v61, %v480_v60  ;;  %v652_v60 = vld [vmem:[#allocation7 + $0x2e8] sm:$0xff] }
  0xa1   :  { %v84_v63 = vpop.permute.xlu1 %83  ;;  %v82_v0 = vpop.permute.xlu0 %81 }
  0xa2   :  { %89 = vst.msk [vmem:[#allocation2 + $0x8] sm:$0xff] %vm87_vm3, %v84_v63  ;;  %88 = vst.msk [vmem:[#allocation2] sm:$0xff] %vm87_vm3, %v82_v0  ;;  %2213 = vmatprep.subr.bf16.mxu1 %v2212_v62  ;;  %v482_v63 = vld [vmem:[#allocation7 + $0x260] sm:$0xff]  ;;  %v483_v0 = vld [vmem:[#allocation7 + $0x268] sm:$0xff] }
  0xa3   :  { %2215 = vmatpush3.bf16.msra.mxu1 %v2212_v62  ;;  %v653_v62 = vld [vmem:[#allocation7 + $0x2f0] sm:$0xff] }
  0xa5   :  { %v98_v1 = vpop.permute.xlu1 %97  ;;  %v96_v2 = vpop.permute.xlu0 %95 }
  0xa6   :  { %103 = vst.msk [vmem:[#allocation2 + $0x8] sm:$0xff] %vm101_vm4, %v98_v1  ;;  %102 = vst.msk [vmem:[#allocation2] sm:$0xff] %vm101_vm4, %v96_v2  ;;  %v2216_v1 = vpack.c.bf16 %v483_v0, %v482_v63  ;;  %v484_v2 = vld [vmem:[#allocation7 + $0x270] sm:$0xff]  ;;  %v654_v63 = vld [vmem:[#allocation7 + $0x2f8] sm:$0xff] }
  0xa7   :  { %v2284_v0 = vpack.c.bf16 %v654_v63, %v653_v62  ;;  %v763_v62 = vld [vmem:[#allocation7 + $0x320] sm:$0xff]  ;;  %v764_v63 = vld [vmem:[#allocation7 + $0x328] sm:$0xff] }
  0xa8   :  { %2217 = vmatprep.subr.bf16.mxu1 %v2216_v1 }
  0xa9   :  { %v112_v3 = vpop.permute.xlu1 %111  ;;  %v110_v4 = vpop.permute.xlu0 %109  ;;  %2219 = vmatpush3.bf16.msra.mxu1 %v2216_v1 }
  0xaa   :  { %117 = vst.msk [vmem:[#allocation2 + $0x8] sm:$0xff] %vm115_vm5, %v112_v3  ;;  %116 = vst.msk [vmem:[#allocation2] sm:$0xff] %vm115_vm5, %v110_v4  ;;  %v485_v3 = vld [vmem:[#allocation7 + $0x278] sm:$0xff] }
  0xab   :  { %v2220_v4 = vpack.c.bf16 %v485_v3, %v484_v2  ;;  %v778_v2 = vld [vmem:[#allocation7 + $0x380] sm:$0xff]  ;;  %v779_v3 = vld [vmem:[#allocation7 + $0x388] sm:$0xff] }
  0xad   :  { %v126_v5 = vpop.permute.xlu1 %125  ;;  %v124_v6 = vpop.permute.xlu0 %123  ;;  %2221 = vmatprep.subr.bf16.mxu1 %v2220_v4 }
  0xae   :  { %131 = vst.msk [vmem:[#allocation2 + $0x8] sm:$0xff] %vm129_vm6, %v126_v5  ;;  %130 = vst.msk [vmem:[#allocation2] sm:$0xff] %vm129_vm6, %v124_v6  ;;  %2223 = vmatpush3.bf16.msra.mxu1 %v2220_v4  ;;  %v451_v5 = vld [vmem:[#allocation7 + $0x180] sm:$0xff]  ;;  %v452_v6 = vld [vmem:[#allocation7 + $0x188] sm:$0xff]  ;;  %v2288_v4 = vpack.c.bf16 %v779_v3, %v778_v2 }
  0xaf   :  { %v766_v2 = vld [vmem:[#allocation7 + $0x338] sm:$0xff] }
  0xb1   :  { %v140_v7 = vpop.permute.xlu1 %139  ;;  %v138_v8 = vpop.permute.xlu0 %137 }
  0xb2   :  { %145 = vst.msk [vmem:[#allocation2 + $0x8] sm:$0xff] %vm143_vm7, %v140_v7  ;;  %144 = vst.msk [vmem:[#allocation2] sm:$0xff] %vm143_vm7, %v138_v8  ;;  %v2224_v7 = vpack.c.bf16 %v452_v6, %v451_v5  ;;  %v1449_v8 = vld [vmem:[%s2757_s2] ss:$0 sm:$0xff]  ;;  %v780_v5 = vld [vmem:[#allocation7 + $0x390] sm:$0xff] }
  0xb3   :  { %v781_v6 = vld [vmem:[#allocation7 + $0x398] sm:$0xff] }
  0xb4   :  { %2225 = vmatprep.subr.bf16.mxu1 %v2224_v7 }
  0xb9   :  { %v2679_v11 = vld [vmem:[#allocation2] sm:$0xff]  ;;  %v2681_v12 = vld [vmem:[#allocation2 + $0x8] sm:$0xff] }
  0xba   :  { %150 = vst [vmem:[#allocation3 + $0x1] sm:$0xff] %v2679_v11  ;;  %1708 = vmatprep.mubr.f32.mxu0 %v2679_v11  ;;  %151 = vst [vmem:[#allocation3 + $0x9] sm:$0xff] %v2681_v12 }
  0xbb   :  { %1709 = vmatmul.mubr.f32.vlgmr.msra.gmra.mrb[0].mxu0 %v2681_v12 }
  0xbc   :  { %2131 = vmatpush3.bf16.msra.mxu0 %v2676_v43  ;;  %v2168_v43 = vpack.c.bf16 %v347_v41, %v346_v40  ;;  %v640_v40 = vld [vmem:[#allocation7 + $0x288] sm:$0xff] }
  0xbd   :  { %2133 = vmatprep.subr.bf16.mxu0 %v2132_v13 }
  0xc0   :  { %2135 = vmatpush3.bf16.msra.mxu0 %v2132_v13 }
  0xc1   :  { %v152_v19 = vld [vmem:[#allocation3] sm:$0xff]  ;;  %2137 = vmatprep.subr.bf16.mxu0 %v2136_v16  ;;  %v153_v39 = vld [vmem:[#allocation3 + $0x8] sm:$0xff] }
  0xc2   :  { %1743 = vmatprep.mubr.f32.mxu0 %v152_v19  ;;  %v339_v42 = vld [vmem:[#allocation3 + $0x2] sm:$0xff]  ;;  %v340_v59 = vld [vmem:[#allocation3 + $0xa] sm:$0xff] }
  0xc4   :  { %2139 = vmatpush3.bf16.msra.mxu0 %v2136_v16  ;;  %v454_v16 = vld [vmem:[#allocation7 + $0x198] sm:$0xff] }
  0xc5   :  { %2141 = vmatprep.subr.bf16.mxu0 %v2140_v20  ;;  %v2228_v19 = vpack.c.bf16 %v454_v16, %v453_v15  ;;  %v786_v16 = vld [vmem:[#allocation7 + $0x3c0] sm:$0xff] }
  0xc8   :  { %2143 = vmatpush3.bf16.msra.mxu0 %v2140_v20  ;;  %v455_v20 = vld [vmem:[#allocation7 + $0x1a0] sm:$0xff] }
  0xc9   :  { %2145 = vmatprep.subr.bf16.mxu0 %v2144_v23  ;;  %v2232_v22 = vpack.c.bf16 %v456_v21, %v455_v20  ;;  %v789_v20 = vld [vmem:[#allocation7 + $0x3d8] sm:$0xff] }
  0xcc   :  { %2147 = vmatpush3.bf16.msra.mxu0 %v2144_v23  ;;  %v457_v23 = vld [vmem:[#allocation7 + $0x1b0] sm:$0xff] }
  0xcd   :  { %2149 = vmatprep.subr.bf16.mxu0 %v2148_v26 }
  0xd0   :  { %2151 = vmatpush3.bf16.msra.mxu0 %v2148_v26  ;;  %v2236_v26 = vpack.c.bf16 %v458_v24, %v457_v23  ;;  %v791_v23 = vld [vmem:[#allocation7 + $0x3e8] sm:$0xff] }
  0xd1   :  { %2153 = vmatprep.subr.bf16.mxu0 %v2152_v29 }
  0xd4   :  { %2155 = vmatpush3.bf16.msra.mxu0 %v2152_v29  ;;  %v2240_v29 = vpack.c.bf16 %v460_v28, %v459_v27  ;;  %v759_v28 = vld [vmem:[#allocation7 + $0x300] sm:$0xff] }
  0xd5   :  { %2157 = vmatprep.subr.bf16.mxu0 %v2156_v32 }
  0xd8   :  { %2159 = vmatpush3.bf16.msra.mxu0 %v2156_v32  ;;  %v2244_v32 = vpack.c.bf16 %v462_v31, %v461_v30  ;;  %v1076_v31 = vld [vmem:[#allocation7 + $0x500] sm:$0xff] }
  0xd9   :  { %2161 = vmatprep.subr.bf16.mxu0 %v2160_v35 }
  0xdb   :  { %1744 = vmatmul.mubr.f32.vlgmr.msra.gmra.mrb[0].mxu0 %v153_v39  ;;  %v639_v39 = vld [vmem:[#allocation7 + $0x280] sm:$0xff] }
  0xdc   :  { %2163 = vmatpush3.bf16.msra.mxu0 %v2160_v35  ;;  %1778 = vmatprep.mubr.f32.mxu0 %v339_v42  ;;  %v2248_v35 = vpack.c.bf16 %v464_v34, %v463_v33  ;;  %v2256_v41 = vpack.c.bf16 %v640_v40, %v639_v39  ;;  %v641_v42 = vld [vmem:[#allocation7 + $0x290] sm:$0xff] }
  0xdd   :  { %2165 = vmatprep.subr.bf16.mxu0 %v2164_v38  ;;  %v1078_v33 = vld [vmem:[#allocation7 + $0x510] sm:$0xff] }
  0xde   :  { %v1082_v40 = vld [vmem:[#allocation7 + $0x530] sm:$0xff] }
  0xe0   :  { %2167 = vmatpush3.bf16.msra.mxu0 %v2164_v38  ;;  %v2252_v38 = vpack.c.bf16 %v466_v37, %v465_v36  ;;  %v1080_v37 = vld [vmem:[#allocation7 + $0x520] sm:$0xff] }
  0xe1   :  { %2169 = vmatprep.subr.bf16.mxu0 %v2168_v43 }
  0xe4   :  { %2171 = vmatpush3.bf16.msra.mxu0 %v2168_v43  ;;  %v642_v43 = vld [vmem:[#allocation7 + $0x298] sm:$0xff] }
  0xe5   :  { %2173 = vmatprep.subr.bf16.mxu0 %v2172_v46  ;;  %v2260_v44 = vpack.c.bf16 %v642_v43, %v641_v42  ;;  %v1084_v43 = vld [vmem:[#allocation7 + $0x540] sm:$0xff] }
  0xe8   :  { %2175 = vmatpush3.bf16.msra.mxu0 %v2172_v46  ;;  %v643_v46 = vld [vmem:[#allocation7 + $0x2a0] sm:$0xff] }
  0xe9   :  { %2177 = vmatprep.subr.bf16.mxu0 %v2176_v49 }
  0xec   :  { %2179 = vmatpush3.bf16.msra.mxu0 %v2176_v49  ;;  %v2264_v49 = vpack.c.bf16 %v644_v47, %v643_v46  ;;  %v1451_v46 = vld [vmem:[%s2757_s2 + $0x1] ss:$0 sm:$0xff] }
  0xed   :  { %2181 = vmatprep.subr.bf16.mxu0 %v2180_v52 }
  0xf0   :  { %2183 = vmatpush3.bf16.msra.mxu0 %v2180_v52  ;;  %v2268_v52 = vpack.c.bf16 %v646_v51, %v645_v50 }
  0xf1   :  { %2185 = vmatprep.subr.bf16.mxu0 %v2184_v55 }
  0xf4   :  { %2187 = vmatpush3.bf16.msra.mxu0 %v2184_v55  ;;  %v2272_v55 = vpack.c.bf16 %v648_v54, %v647_v53 }
  0xf5   :  { %2189 = vmatprep.subr.bf16.mxu0 %v2188_v58 }
  0xf8   :  { %2191 = vmatpush3.bf16.msra.mxu0 %v2188_v58  ;;  %v2276_v58 = vpack.c.bf16 %v650_v57, %v649_v56  ;;  %v761_v57 = vld [vmem:[#allocation7 + $0x310] sm:$0xff] }
  0xf9   :  { %2289 = vmatprep.subr.bf16.mxu0 %v2288_v4 }
  0xfb   :  { %1779 = vmatmul.mubr.f32.vlgmr.msra.gmra.mrb[0].mxu0 %v340_v59  ;;  %v651_v59 = vld [vmem:[#allocation7 + $0x2e0] sm:$0xff] }
  0xfc   :  { %v2280_v61 = vpack.c.bf16 %v652_v60, %v651_v59  ;;  %2291 = vmatpush3.bf16.msra.mxu0 %v2288_v4 }
 0x1ce   :  { %v1780_v9 = vpop.f32.mrb[0].mxu0 }
 0x1cf   :  { %v443_v10 = vadd.f32 %v1780_v9, %v1449_v8  ;;  %v424_v13 = vpop.f32.mrb[1].mxu0  ;;  %v783_v9 = vld [vmem:[#allocation7 + $0x3a8] sm:$0xff] }
 0x1d0   :  { %v442_v14 = vadd.f32 %v1449_v8, %v424_v13  ;;  %v782_v8 = vld [vmem:[#allocation7 + $0x3a0] sm:$0xff]  ;;  %v784_v13 = vld [vmem:[#allocation7 + $0x3b0] sm:$0xff] }
 0x1d1   :  { %v445_v17 = vmax.f32 %v443_v10, 0.0  ;;  %v2296_v10 = vpack.c.bf16 %v783_v9, %v782_v8  ;;  %v769_v8 = vld [vmem:[#allocation7 + $0x350] sm:$0xff]  ;;  %v770_v9 = vld [vmem:[#allocation7 + $0x358] sm:$0xff] }
 0x1d2   :  { %v444_v18 = vmax.f32 %v442_v14, 0.0  ;;  %v785_v14 = vld [vmem:[#allocation7 + $0x3b8] sm:$0xff] }
 0x1d3   :  { %447 = vst [vmem:[#allocation3 + $0x9] sm:$0xff] %v445_v17  ;;  %v2300_v15 = vpack.c.bf16 %v785_v14, %v784_v13  ;;  %v771_v13 = vld [vmem:[#allocation7 + $0x360] sm:$0xff]  ;;  %v772_v14 = vld [vmem:[#allocation7 + $0x368] sm:$0xff] }
 0x1d4   :  { %446 = vst [vmem:[#allocation3 + $0x1] sm:$0xff] %v444_v18  ;;  %1813 = vmatprep.mubr.f32.mxu1 %v444_v18 }
 0x1d5   :  { %1814 = vmatmul.mubr.f32.vlgmr.msra.gmra.mrb[0].mxu1 %v445_v17  ;;  %v787_v17 = vld [vmem:[#allocation7 + $0x3c8] sm:$0xff] }
 0x1d6   :  { %2227 = vmatpush3.bf16.msra.mxu1 %v2224_v7  ;;  %v2292_v7 = vpack.c.bf16 %v781_v6, %v780_v5  ;;  %v2304_v18 = vpack.c.bf16 %v787_v17, %v786_v16  ;;  %v767_v5 = vld [vmem:[#allocation7 + $0x340] sm:$0xff]  ;;  %v768_v6 = vld [vmem:[#allocation7 + $0x348] sm:$0xff]  ;;  %v773_v16 = vld [vmem:[#allocation7 + $0x370] sm:$0xff] }
 0x1d7   :  { %2229 = vmatprep.subr.bf16.mxu1 %v2228_v19  ;;  %v774_v17 = vld [vmem:[#allocation7 + $0x378] sm:$0xff] }
 0x1d8   :  { %2293 = vmatprep.subr.bf16.mxu0 %v2292_v7 }
 0x1d9   :  { %2295 = vmatpush3.bf16.msra.mxu0 %v2292_v7  ;;  %v2336_v7 = vpack.c.bf16 %v768_v6, %v767_v5  ;;  %v1061_v6 = vld [vmem:[#allocation7 + $0x4a0] sm:$0xff] }
 0x1da   :  { %2231 = vmatpush3.bf16.msra.mxu1 %v2228_v19  ;;  %v637_v1 = vld [vmem:[#allocation3 + $0xa] sm:$0xff]  ;;  %2297 = vmatprep.subr.bf16.mxu0 %v2296_v10 }
 0x1db   :  { %v448_v25 = vld [vmem:[#allocation3] sm:$0xff]  ;;  %2233 = vmatprep.subr.bf16.mxu1 %v2232_v22  ;;  %v449_v45 = vld [vmem:[#allocation3 + $0x8] sm:$0xff] }
 0x1dc   :  { %1848 = vmatprep.mubr.f32.mxu1 %v448_v25  ;;  %v636_v48 = vld [vmem:[#allocation3 + $0x2] sm:$0xff] }
 0x1dd   :  { %2299 = vmatpush3.bf16.msra.mxu0 %v2296_v10  ;;  %v788_v19 = vld [vmem:[#allocation7 + $0x3d0] sm:$0xff]  ;;  %v2340_v10 = vpack.c.bf16 %v770_v9, %v769_v8 }
 0x1de   :  { %2235 = vmatpush3.bf16.msra.mxu1 %v2232_v22  ;;  %2301 = vmatprep.subr.bf16.mxu0 %v2300_v15  ;;  %v2308_v21 = vpack.c.bf16 %v789_v20, %v788_v19  ;;  %v790_v22 = vld [vmem:[#allocation7 + $0x3e0] sm:$0xff]  ;;  %v792_v25 = vld [vmem:[#allocation7 + $0x3f0] sm:$0xff]  ;;  %v948_v20 = vld [vmem:[#allocation7 + $0x408] sm:$0xff] }
 0x1df   :  { %2237 = vmatprep.subr.bf16.mxu1 %v2236_v26  ;;  %v2312_v24 = vpack.c.bf16 %v791_v23, %v790_v22  ;;  %v947_v19 = vld [vmem:[#allocation7 + $0x400] sm:$0xff]  ;;  %v949_v22 = vld [vmem:[#allocation7 + $0x410] sm:$0xff]  ;;  %v950_v23 = vld [vmem:[#allocation7 + $0x418] sm:$0xff] }
 0x1e0   :  { %v1063_v9 = vld [vmem:[#allocation7 + $0x4b0] sm:$0xff] }
 0x1e1   :  { %2303 = vmatpush3.bf16.msra.mxu0 %v2300_v15  ;;  %v2344_v15 = vpack.c.bf16 %v772_v14, %v771_v13 }
 0x1e2   :  { %2239 = vmatpush3.bf16.msra.mxu1 %v2236_v26  ;;  %2305 = vmatprep.subr.bf16.mxu0 %v2304_v18  ;;  %v793_v26 = vld [vmem:[#allocation7 + $0x3f8] sm:$0xff] }
 0x1e3   :  { %2241 = vmatprep.subr.bf16.mxu1 %v2240_v29  ;;  %v2316_v27 = vpack.c.bf16 %v793_v26, %v792_v25  ;;  %v951_v26 = vld [vmem:[#allocation7 + $0x420] sm:$0xff] }
 0x1e5   :  { %2307 = vmatpush3.bf16.msra.mxu0 %v2304_v18  ;;  %v2348_v18 = vpack.c.bf16 %v774_v17, %v773_v16  ;;  %v1066_v16 = vld [vmem:[#allocation7 + $0x4c8] sm:$0xff] }
 0x1e6   :  { %2243 = vmatpush3.bf16.msra.mxu1 %v2240_v29  ;;  %2309 = vmatprep.subr.bf16.mxu0 %v2308_v21  ;;  %v760_v29 = vld [vmem:[#allocation7 + $0x308] sm:$0xff] }
 0x1e7   :  { %2245 = vmatprep.subr.bf16.mxu1 %v2244_v32  ;;  %v2320_v30 = vpack.c.bf16 %v760_v29, %v759_v28 }
 0x1e9   :  { %2311 = vmatpush3.bf16.msra.mxu0 %v2308_v21  ;;  %v2352_v21 = vpack.c.bf16 %v948_v20, %v947_v19  ;;  %v1068_v19 = vld [vmem:[#allocation7 + $0x4d8] sm:$0xff] }
 0x1ea   :  { %2247 = vmatpush3.bf16.msra.mxu1 %v2244_v32  ;;  %2313 = vmatprep.subr.bf16.mxu0 %v2312_v24  ;;  %v1077_v32 = vld [vmem:[#allocation7 + $0x508] sm:$0xff] }
 0x1eb   :  { %2249 = vmatprep.subr.bf16.mxu1 %v2248_v35  ;;  %v2384_v34 = vpack.c.bf16 %v1077_v32, %v1076_v31  ;;  %v954_v31 = vld [vmem:[#allocation7 + $0x438] sm:$0xff] }
 0x1ed   :  { %2315 = vmatpush3.bf16.msra.mxu0 %v2312_v24  ;;  %v2356_v24 = vpack.c.bf16 %v950_v23, %v949_v22  ;;  %v1070_v22 = vld [vmem:[#allocation7 + $0x4e8] sm:$0xff] }
 0x1ee   :  { %2251 = vmatpush3.bf16.msra.mxu1 %v2248_v35  ;;  %2317 = vmatprep.subr.bf16.mxu0 %v2316_v27  ;;  %v1079_v35 = vld [vmem:[#allocation7 + $0x518] sm:$0xff] }
 0x1ef   :  { %2253 = vmatprep.subr.bf16.mxu1 %v2252_v38  ;;  %v2388_v36 = vpack.c.bf16 %v1079_v35, %v1078_v33  ;;  %v955_v33 = vld [vmem:[#allocation7 + $0x440] sm:$0xff] }
 0x1f1   :  { %2319 = vmatpush3.bf16.msra.mxu0 %v2316_v27  ;;  %v952_v27 = vld [vmem:[#allocation7 + $0x428] sm:$0xff] }
 0x1f2   :  { %2255 = vmatpush3.bf16.msra.mxu1 %v2252_v38  ;;  %2321 = vmatprep.subr.bf16.mxu0 %v2320_v30  ;;  %v1081_v38 = vld [vmem:[#allocation7 + $0x528] sm:$0xff]  ;;  %v2360_v29 = vpack.c.bf16 %v952_v27, %v951_v26  ;;  %v1245_v27 = vld [vmem:[#allocation7 + $0x580] sm:$0xff] }
 0x1f3   :  { %2257 = vmatprep.subr.bf16.mxu1 %v2256_v41  ;;  %v2392_v39 = vpack.c.bf16 %v1081_v38, %v1080_v37  ;;  %v958_v37 = vld [vmem:[#allocation7 + $0x458] sm:$0xff] }
 0x1f5   :  { %1849 = vmatmul.mubr.f32.vlgmr.msra.gmra.mrb[0].mxu1 %v449_v45 }
 0x1f6   :  { %2259 = vmatpush3.bf16.msra.mxu1 %v2256_v41  ;;  %1883 = vmatprep.mubr.f32.mxu1 %v636_v48  ;;  %v1083_v41 = vld [vmem:[#allocation7 + $0x538] sm:$0xff] }
 0x1f7   :  { %2261 = vmatprep.subr.bf16.mxu1 %v2260_v44  ;;  %v2396_v42 = vpack.c.bf16 %v1083_v41, %v1082_v40  ;;  %v960_v40 = vld [vmem:[#allocation7 + $0x468] sm:$0xff] }
 0x1fa   :  { %2263 = vmatpush3.bf16.msra.mxu1 %v2260_v44  ;;  %v1085_v44 = vld [vmem:[#allocation7 + $0x548] sm:$0xff] }
 0x1fb   :  { %2265 = vmatprep.subr.bf16.mxu1 %v2264_v49  ;;  %v2400_v45 = vpack.c.bf16 %v1085_v44, %v1084_v43  ;;  %v962_v43 = vld [vmem:[#allocation7 + $0x478] sm:$0xff] }
 0x1fe   :  { %2267 = vmatpush3.bf16.msra.mxu1 %v2264_v49 }
 0x1ff   :  { %2269 = vmatprep.subr.bf16.mxu1 %v2268_v52 }
 0x202   :  { %2271 = vmatpush3.bf16.msra.mxu1 %v2268_v52 }
 0x203   :  { %2273 = vmatprep.subr.bf16.mxu1 %v2272_v55 }
 0x206   :  { %2275 = vmatpush3.bf16.msra.mxu1 %v2272_v55 }
 0x207   :  { %2277 = vmatprep.subr.bf16.mxu1 %v2276_v58 }
 0x20a   :  { %2279 = vmatpush3.bf16.msra.mxu1 %v2276_v58  ;;  %v762_v58 = vld [vmem:[#allocation7 + $0x318] sm:$0xff] }
 0x20b   :  { %2281 = vmatprep.subr.bf16.mxu1 %v2280_v61 }
 0x20e   :  { %2283 = vmatpush3.bf16.msra.mxu1 %v2280_v61  ;;  %v2324_v61 = vpack.c.bf16 %v762_v58, %v761_v57  ;;  %v1057_v57 = vld [vmem:[#allocation7 + $0x480] sm:$0xff]  ;;  %v1058_v58 = vld [vmem:[#allocation7 + $0x488] sm:$0xff] }
 0x20f   :  { %2285 = vmatprep.subr.bf16.mxu1 %v2284_v0 }
 0x212   :  { %2287 = vmatpush3.bf16.msra.mxu1 %v2284_v0  ;;  %v2328_v0 = vpack.c.bf16 %v764_v63, %v763_v62 }
 0x213   :  { %2385 = vmatprep.subr.bf16.mxu1 %v2384_v34 }
 0x215   :  { %1884 = vmatmul.mubr.f32.vlgmr.msra.gmra.mrb[0].mxu1 %v637_v1  ;;  %v765_v1 = vld [vmem:[#allocation7 + $0x330] sm:$0xff] }
 0x216   :  { %2387 = vmatpush3.bf16.msra.mxu1 %v2384_v34  ;;  %v2332_v4 = vpack.c.bf16 %v766_v2, %v765_v1  ;;  %v956_v34 = vld [vmem:[#allocation7 + $0x448] sm:$0xff]  ;;  %v1059_v1 = vld [vmem:[#allocation7 + $0x490] sm:$0xff]  ;;  %v1060_v2 = vld [vmem:[#allocation7 + $0x498] sm:$0xff] }
 0x217   :  { %2389 = vmatprep.subr.bf16.mxu1 %v2388_v36  ;;  %v2368_v35 = vpack.c.bf16 %v956_v34, %v955_v33  ;;  %v2420_v5 = vpack.c.bf16 %v1060_v2, %v1059_v1  ;;  %v1249_v34 = vld [vmem:[#allocation7 + $0x5a0] sm:$0xff] }
 0x21a   :  { %2391 = vmatpush3.bf16.msra.mxu1 %v2388_v36  ;;  %v957_v36 = vld [vmem:[#allocation7 + $0x450] sm:$0xff] }
 0x21b   :  { %2393 = vmatprep.subr.bf16.mxu1 %v2392_v39  ;;  %v2372_v38 = vpack.c.bf16 %v958_v37, %v957_v36 }
 0x21e   :  { %2395 = vmatpush3.bf16.msra.mxu1 %v2392_v39  ;;  %v959_v39 = vld [vmem:[#allocation7 + $0x460] sm:$0xff] }
 0x21f   :  { %2397 = vmatprep.subr.bf16.mxu1 %v2396_v42  ;;  %v2376_v41 = vpack.c.bf16 %v960_v40, %v959_v39  ;;  %v1252_v39 = vld [vmem:[#allocation7 + $0x5b8] sm:$0xff] }
 0x222   :  { %2399 = vmatpush3.bf16.msra.mxu1 %v2396_v42  ;;  %v961_v42 = vld [vmem:[#allocation7 + $0x470] sm:$0xff] }
 0x223   :  { %2401 = vmatprep.subr.bf16.mxu1 %v2400_v45  ;;  %v2380_v44 = vpack.c.bf16 %v962_v43, %v961_v42  ;;  %v1254_v42 = vld [vmem:[#allocation7 + $0x5c8] sm:$0xff] }
 0x226   :  { %2403 = vmatpush3.bf16.msra.mxu1 %v2400_v45 }
 0x2e8   :  { %v1885_v47 = vpop.f32.mrb[0].mxu1 }
 0x2e9   :  { %v2694_v48 = vadd.f32 %v1885_v47, %v1451_v46  ;;  %v721_v49 = vpop.f32.mrb[1].mxu1  ;;  %v1087_v47 = vld [vmem:[#allocation7 + $0x558] sm:$0xff] }
 0x2ea   :  { %v2696_v50 = vadd.f32 %v1451_v46, %v721_v49  ;;  %v1086_v46 = vld [vmem:[#allocation7 + $0x550] sm:$0xff] }
 0x2eb   :  { %v1453_v51 = vmul.f32 -1.442695, %v2694_v48  ;;  %v2404_v49 = vpack.c.bf16 %v1087_v47, %v1086_v46  ;;  %v1257_v47 = vld [vmem:[#allocation7 + $0x5e0] sm:$0xff] }
 0x2ec   :  { %v1452_v52 = vmul.f32 -1.442695, %v2696_v50 }
 0x2ed   :  { %2509 = vpow2.f32 %v1453_v51  ;;  %2405 = vmatprep.subr.bf16.mxu1 %v2404_v49  ;;  %v1088_v51 = vld [vmem:[#allocation7 + $0x560] sm:$0xff] }
 0x2ee   :  { %2511 = vpow2.f32 %v1452_v52  ;;  %2407 = vmatpush3.bf16.msra.mxu1 %v2404_v49  ;;  %v1089_v52 = vld [vmem:[#allocation7 + $0x568] sm:$0xff] }
 0x2ef   :  { %v1258_v49 = vld [vmem:[#allocation7 + $0x5e8] sm:$0xff] }
 0x2f7   :  { %v2510_v53 = vpop.eup %2509 }
 0x2f8   :  { %v2512_v54 = vpop.eup %2511  ;;  %v749_v55 = vadd.f32 1.0, %v2510_v53  ;;  %v2408_v53 = vpack.c.bf16 %v1089_v52, %v1088_v51  ;;  %v2472_v51 = vpack.c.bf16 %v1258_v49, %v1257_v47  ;;  %v1259_v52 = vld [vmem:[#allocation7 + $0x5f0] sm:$0xff] }
 0x2f9   :  { %v748_v56 = vadd.f32 1.0, %v2512_v54  ;;  %v1090_v54 = vld [vmem:[#allocation7 + $0x570] sm:$0xff] }
 0x2fa   :  { %2513 = vrcp.f32 %v749_v55  ;;  %2409 = vmatprep.subr.bf16.mxu1 %v2408_v53  ;;  %v1091_v55 = vld [vmem:[#allocation7 + $0x578] sm:$0xff] }
 0x2fb   :  { %2515 = vrcp.f32 %v748_v56  ;;  %2411 = vmatpush3.bf16.msra.mxu1 %v2408_v53  ;;  %v2412_v56 = vpack.c.bf16 %v1091_v55, %v1090_v54  ;;  %v1260_v53 = vld [vmem:[#allocation7 + $0x5f8] sm:$0xff] }
 0x2fc   :  { %v2476_v54 = vpack.c.bf16 %v1260_v53, %v1259_v52 }
 0x2fd   :  { %2413 = vmatprep.subr.bf16.mxu1 %v2412_v56 }
 0x2ff   :  { %2415 = vmatpush3.bf16.msra.mxu1 %v2412_v56  ;;  %v1457_v56 = vld [vmem:[%s2757_s2 + $0x3] ss:$0 sm:$0xff] }
 0x304   :  { %v2514_v59 = vpop.eup %2513 }
 0x305   :  { %v2516_v60 = vpop.eup %2515  ;;  %755 = vst [vmem:[#allocation3 + $0x9] sm:$0xff] %v2514_v59 }
 0x306   :  { %754 = vst [vmem:[#allocation3 + $0x1] sm:$0xff] %v2516_v60  ;;  %1918 = vmatprep.mubr.f32.mxu0 %v2516_v60  ;;  %v1455_v60 = vld [vmem:[%s2757_s2 + $0x2] ss:$0 sm:$0xff]  ;;  %s2609_s2 = smov [#allocation9]  }
 0x307   :  { %1919 = vmatmul.mubr.f32.vlgmr.msra.gmra.mrb[2].mxu0 %v2514_v59  ;;  %v2416_v59 = vpack.c.bf16 %v1058_v58, %v1057_v57  ;;  %s1436_s26 = sshll.u32 %s2609_s2, 4  ;;  %s1437_s26 = int_to_ptr.vmem [resolvable:$true] %s1436_s26 }
 0x308   :  { %2323 = vmatpush3.bf16.msra.mxu0 %v2320_v30  ;;  %v953_v30 = vld [vmem:[#allocation7 + $0x430] sm:$0xff]  ;;  %s2569_s27 = scalar_lea.vmem %s1437_s26, 2048  ;;  %p2574_p3 = scmp.lt.s32.totalorder %s1437_s26, %s1437_s26 }
 0x309   :  { %2325 = vmatprep.subr.bf16.mxu0 %v2324_v61  ;;  %v2364_v32 = vpack.c.bf16 %v954_v31, %v953_v30  ;;  %2417 = vmatprep.subr.bf16.mxu1 %v2416_v59  ;;  %v1247_v30 = vld [vmem:[#allocation7 + $0x590] sm:$0xff]  ;;  %v1248_v31 = vld [vmem:[#allocation7 + $0x598] sm:$0xff]  ;;  %p2570_p2 = scmp.ne.s32.totalorder %s1437_s26, %s2569_s27  ;;  %p2575_p4 = scmp.lt.s32.totalorder %s2569_s27, %s2569_s27 }
 0x30b   :  { %p2576_p5 = por %p2575_p4, %p2574_p3 }
 0x30c   :  { %2327 = vmatpush3.bf16.msra.mxu0 %v2324_v61  ;;  %v945_v45 = vld [vmem:[#allocation3 + $0xa] sm:$0xff] }
 0x30d   :  { %v756_v3 = vld [vmem:[#allocation3] sm:$0xff]  ;;  %2329 = vmatprep.subr.bf16.mxu0 %v2328_v0  ;;  %v757_v25 = vld [vmem:[#allocation3 + $0x8] sm:$0xff]  ;;  %p2577_p6 = pnand %p2576_p5, %p2570_p2 }
 0x30e   :  { %1953 = vmatprep.mubr.f32.mxu0 %v756_v3  ;;  %v944_v28 = vld [vmem:[#allocation3 + $0x2] sm:$0xff] }
 0x310   :  { %2331 = vmatpush3.bf16.msra.mxu0 %v2328_v0 }
 0x311   :  { %2333 = vmatprep.subr.bf16.mxu0 %v2332_v4 }
 0x314   :  { %2335 = vmatpush3.bf16.msra.mxu0 %v2332_v4 }
 0x315   :  { %2337 = vmatprep.subr.bf16.mxu0 %v2336_v7 }
 0x318   :  { %2339 = vmatpush3.bf16.msra.mxu0 %v2336_v7  ;;  %v1062_v7 = vld [vmem:[#allocation7 + $0x4a8] sm:$0xff] }
 0x319   :  { %2341 = vmatprep.subr.bf16.mxu0 %v2340_v10  ;;  %v2424_v8 = vpack.c.bf16 %v1062_v7, %v1061_v6 }
 0x31c   :  { %2343 = vmatpush3.bf16.msra.mxu0 %v2340_v10  ;;  %v1064_v10 = vld [vmem:[#allocation7 + $0x4b8] sm:$0xff] }
 0x31d   :  { %2345 = vmatprep.subr.bf16.mxu0 %v2344_v15  ;;  %v2428_v14 = vpack.c.bf16 %v1064_v10, %v1063_v9 }
 0x320   :  { %2347 = vmatpush3.bf16.msra.mxu0 %v2344_v15  ;;  %v1065_v15 = vld [vmem:[#allocation7 + $0x4c0] sm:$0xff] }
 0x321   :  { %2349 = vmatprep.subr.bf16.mxu0 %v2348_v18  ;;  %v2432_v17 = vpack.c.bf16 %v1066_v16, %v1065_v15 }
 0x324   :  { %2351 = vmatpush3.bf16.msra.mxu0 %v2348_v18  ;;  %v1067_v18 = vld [vmem:[#allocation7 + $0x4d0] sm:$0xff] }
 0x325   :  { %2353 = vmatprep.subr.bf16.mxu0 %v2352_v21  ;;  %v2436_v20 = vpack.c.bf16 %v1068_v19, %v1067_v18 }
 0x327   :  { %1954 = vmatmul.mubr.f32.vlgmr.msra.gmra.mrb[2].mxu0 %v757_v25  ;;  %v1072_v25 = vld [vmem:[#allocation7 + $0x4f8] sm:$0xff] }
 0x328   :  { %2355 = vmatpush3.bf16.msra.mxu0 %v2352_v21  ;;  %1988 = vmatprep.mubr.f32.mxu0 %v944_v28  ;;  %v1069_v21 = vld [vmem:[#allocation7 + $0x4e0] sm:$0xff]  ;;  %v1246_v28 = vld [vmem:[#allocation7 + $0x588] sm:$0xff] }
 0x329   :  { %2357 = vmatprep.subr.bf16.mxu0 %v2356_v24  ;;  %v2440_v23 = vpack.c.bf16 %v1070_v22, %v1069_v21 }
 0x32c   :  { %2359 = vmatpush3.bf16.msra.mxu0 %v2356_v24  ;;  %v1071_v24 = vld [vmem:[#allocation7 + $0x4f0] sm:$0xff] }
 0x32d   :  { %2361 = vmatprep.subr.bf16.mxu0 %v2360_v29  ;;  %v2444_v26 = vpack.c.bf16 %v1072_v25, %v1071_v24 }
 0x330   :  { %2363 = vmatpush3.bf16.msra.mxu0 %v2360_v29  ;;  %v2448_v29 = vpack.c.bf16 %v1246_v28, %v1245_v27 }
 0x331   :  { %2365 = vmatprep.subr.bf16.mxu0 %v2364_v32 }
 0x334   :  { %2367 = vmatpush3.bf16.msra.mxu0 %v2364_v32  ;;  %v2452_v32 = vpack.c.bf16 %v1248_v31, %v1247_v30 }
 0x335   :  { %2369 = vmatprep.subr.bf16.mxu0 %v2368_v35 }
 0x338   :  { %2371 = vmatpush3.bf16.msra.mxu0 %v2368_v35  ;;  %v1250_v35 = vld [vmem:[#allocation7 + $0x5a8] sm:$0xff] }
 0x339   :  { %2373 = vmatprep.subr.bf16.mxu0 %v2372_v38  ;;  %v2456_v37 = vpack.c.bf16 %v1250_v35, %v1249_v34 }
 0x33c   :  { %2375 = vmatpush3.bf16.msra.mxu0 %v2372_v38  ;;  %v1251_v38 = vld [vmem:[#allocation7 + $0x5b0] sm:$0xff] }
 0x33d   :  { %2377 = vmatprep.subr.bf16.mxu0 %v2376_v41  ;;  %v2460_v40 = vpack.c.bf16 %v1252_v39, %v1251_v38 }
 0x340   :  { %2379 = vmatpush3.bf16.msra.mxu0 %v2376_v41  ;;  %v1253_v41 = vld [vmem:[#allocation7 + $0x5c0] sm:$0xff] }
 0x341   :  { %2381 = vmatprep.subr.bf16.mxu0 %v2380_v44  ;;  %v2464_v43 = vpack.c.bf16 %v1254_v42, %v1253_v41 }
 0x344   :  { %2383 = vmatpush3.bf16.msra.mxu0 %v2380_v44  ;;  %v1255_v44 = vld [vmem:[#allocation7 + $0x5d0] sm:$0xff] }
 0x347   :  { %1989 = vmatmul.mubr.f32.vlgmr.msra.gmra.mrb[2].mxu0 %v945_v45  ;;  %v1256_v45 = vld [vmem:[#allocation7 + $0x5d8] sm:$0xff] }
 0x348   :  { %v2468_v46 = vpack.c.bf16 %v1256_v45, %v1255_v44 }
 0x41a   :  { %v1990_v61 = vpop.f32.mrb[2].mxu0 }
 0x41b   :  { %v1049_v62 = vadd.f32 %v1990_v61, %v1455_v60  ;;  %v1029_v63 = vpop.f32.mrb[3].mxu0 }
 0x41c   :  { %v1048_v0 = vadd.f32 %v1455_v60, %v1029_v63 }
 0x41d   :  { %v1051_v3 = vmax.f32 %v1049_v62, 0.0 }
 0x41e   :  { %v1050_v4 = vmax.f32 %v1048_v0, 0.0 }
 0x41f   :  { %1053 = vst [vmem:[#allocation3 + $0x9] sm:$0xff] %v1051_v3 }
 0x420   :  { %1052 = vst [vmem:[#allocation3 + $0x1] sm:$0xff] %v1050_v4  ;;  %2023 = vmatprep.mubr.f32.mxu1 %v1050_v4 }
 0x421   :  { %2024 = vmatmul.mubr.f32.vlgmr.msra.gmra.mrb[2].mxu1 %v1051_v3 }
 0x422   :  { %2419 = vmatpush3.bf16.msra.mxu1 %v2416_v59 }
 0x423   :  { %2421 = vmatprep.subr.bf16.mxu1 %v2420_v5 }
 0x426   :  { %2423 = vmatpush3.bf16.msra.mxu1 %v2420_v5  ;;  %v1243_v55 = vld [vmem:[#allocation3 + $0xa] sm:$0xff] }
 0x427   :  { %v1054_v13 = vld [vmem:[#allocation3] sm:$0xff]  ;;  %2425 = vmatprep.subr.bf16.mxu1 %v2424_v8  ;;  %v1055_v33 = vld [vmem:[#allocation3 + $0x8] sm:$0xff] }
 0x428   :  { %2058 = vmatprep.mubr.f32.mxu1 %v1054_v13  ;;  %v1242_v36 = vld [vmem:[#allocation3 + $0x2] sm:$0xff] }
 0x42a   :  { %2427 = vmatpush3.bf16.msra.mxu1 %v2424_v8 }
 0x42b   :  { %2429 = vmatprep.subr.bf16.mxu1 %v2428_v14 }
 0x42e   :  { %2431 = vmatpush3.bf16.msra.mxu1 %v2428_v14 }
 0x42f   :  { %2433 = vmatprep.subr.bf16.mxu1 %v2432_v17 }
 0x432   :  { %2435 = vmatpush3.bf16.msra.mxu1 %v2432_v17 }
 0x433   :  { %2437 = vmatprep.subr.bf16.mxu1 %v2436_v20 }
 0x436   :  { %2439 = vmatpush3.bf16.msra.mxu1 %v2436_v20 }
 0x437   :  { %2441 = vmatprep.subr.bf16.mxu1 %v2440_v23 }
 0x43a   :  { %2443 = vmatpush3.bf16.msra.mxu1 %v2440_v23 }
 0x43b   :  { %2445 = vmatprep.subr.bf16.mxu1 %v2444_v26 }
 0x43e   :  { %2447 = vmatpush3.bf16.msra.mxu1 %v2444_v26 }
 0x43f   :  { %2449 = vmatprep.subr.bf16.mxu1 %v2448_v29 }
 0x441   :  { %2059 = vmatmul.mubr.f32.vlgmr.msra.gmra.mrb[2].mxu1 %v1055_v33 }
 0x442   :  { %2451 = vmatpush3.bf16.msra.mxu1 %v2448_v29  ;;  %2093 = vmatprep.mubr.f32.mxu1 %v1242_v36 }
 0x443   :  { %2453 = vmatprep.subr.bf16.mxu1 %v2452_v32 }
 0x446   :  { %2455 = vmatpush3.bf16.msra.mxu1 %v2452_v32 }
 0x447   :  { %2457 = vmatprep.subr.bf16.mxu1 %v2456_v37 }
 0x44a   :  { %2459 = vmatpush3.bf16.msra.mxu1 %v2456_v37 }
 0x44b   :  { %2461 = vmatprep.subr.bf16.mxu1 %v2460_v40 }
 0x44e   :  { %2463 = vmatpush3.bf16.msra.mxu1 %v2460_v40 }
 0x44f   :  { %2465 = vmatprep.subr.bf16.mxu1 %v2464_v43 }
 0x452   :  { %2467 = vmatpush3.bf16.msra.mxu1 %v2464_v43 }
 0x453   :  { %2469 = vmatprep.subr.bf16.mxu1 %v2468_v46 }
 0x456   :  { %2471 = vmatpush3.bf16.msra.mxu1 %v2468_v46 }
 0x457   :  { %2473 = vmatprep.subr.bf16.mxu1 %v2472_v51 }
 0x45a   :  { %2475 = vmatpush3.bf16.msra.mxu1 %v2472_v51 }
 0x45b   :  { %2477 = vmatprep.subr.bf16.mxu1 %v2476_v54 }
 0x45e   :  { %2479 = vmatpush3.bf16.msra.mxu1 %v2476_v54 }
 0x461   :  { %2094 = vmatmul.mubr.f32.vlgmr.msra.gmra.mrb[2].mxu1 %v1243_v55 }
 0x534   :  { %v2095_v57 = vpop.f32.mrb[2].mxu1 }
 0x535   :  { %v1347_v58 = vadd.f32 %v2095_v57, %v1457_v56  ;;  %v1327_v59 = vpop.f32.mrb[3].mxu1 }
 0x536   :  { %v1346_v60 = vadd.f32 %v1457_v56, %v1327_v59 }
 0x537   :  { %v1459_v61 = vmul.f32 -1.442695, %v1347_v58 }
 0x538   :  { %v1458_v62 = vmul.f32 -1.442695, %v1346_v60 }
 0x539   :  { %2517 = vpow2.f32 %v1459_v61 }
 0x53a   :  { %2519 = vpow2.f32 %v1458_v62 }
 0x543   :  { %v2518_v63 = vpop.eup %2517 }
 0x544   :  { %v2520_v0 = vpop.eup %2519  ;;  %v1355_v1 = vadd.f32 1.0, %v2518_v63 }
 0x545   :  { %v1354_v2 = vadd.f32 1.0, %v2520_v0 }
 0x546   :  { %2521 = vrcp.f32 %v1355_v1 }
 0x547   :  { %2523 = vrcp.f32 %v1354_v2 }
 0x550   :  { %v2522_v3 = vpop.eup %2521 }
 0x551   :  { %v2524_v4 = vpop.eup %2523  ;;  %v1361_v5 = vmul.f32 %v2522_v3, %v2694_v48 }
 0x552   :  { %v1360_v6 = vmul.f32 %v2524_v4, %v2696_v50 }
 0x553   :  { %v1363_v7 = vadd.f32 %v1361_v5, %v2681_v12 }
 0x554   :  { %v1362_v8 = vadd.f32 %v1360_v6, %v2679_v11 }
 0x555   :  { %1365 = vst.msk [vmem:[#allocation9 + $0x8] sm:$0xff] %vm45_vm0, %v1363_v7  ;;  %1370 = vrot.lane.b32.xlu1 %v1363_v7, %s2608_s15 }
 0x556   :  { %1364 = vst.msk [vmem:[#allocation9] sm:$0xff] %vm45_vm0, %v1362_v8  ;;  %1368 = vrot.lane.b32.xlu0 %v1362_v8, %s2608_s15 }
 0x559   :  { %1379 = vrot.lane.b32.xlu1 %v1363_v7, %s2606_s14 }
 0x55a   :  { %1377 = vrot.lane.b32.xlu0 %v1362_v8, %s2606_s14 }
 0x55d   :  { %1388 = vrot.lane.b32.xlu1 %v1363_v7, %s2605_s13 }
 0x55e   :  { %1386 = vrot.lane.b32.xlu0 %v1362_v8, %s2605_s13 }
 0x561   :  { %1397 = vrot.lane.b32.xlu1 %v1363_v7, %s2604_s12 }
 0x562   :  { %1395 = vrot.lane.b32.xlu0 %v1362_v8, %s2604_s12 }
 0x565   :  { %1406 = vrot.lane.b32.xlu1 %v1363_v7, %s2603_s1 }
 0x566   :  { %1404 = vrot.lane.b32.xlu0 %v1362_v8, %s2603_s1 }
 0x569   :  { %1415 = vrot.lane.b32.xlu1 %v1363_v7, %s2601_s10 }
 0x56a   :  { %1413 = vrot.lane.b32.xlu0 %v1362_v8, %s2601_s10 }
 0x56d   :  { %1424 = vrot.lane.b32.xlu1 %v1363_v7, %s2602_s11 }
 0x56e   :  { %1422 = vrot.lane.b32.xlu0 %v1362_v8, %s2602_s11 }
 0x5c7   :  { %v1371_v11 = vpop.permute.xlu1 %1370 }
 0x5c8   :  { %1376 = vst.msk [vmem:[#allocation9 + $0x18] sm:$0xff] %vm45_vm0, %v1371_v11  ;;  %v1369_v12 = vpop.permute.xlu0 %1368 }
 0x5c9   :  { %1375 = vst.msk [vmem:[#allocation9 + $0x10] sm:$0xff] %vm45_vm0, %v1369_v12 }
 0x5cb   :  { %v1380_v48 = vpop.permute.xlu1 %1379 }
 0x5cc   :  { %1385 = vst.msk [vmem:[#allocation9 + $0x28] sm:$0xff] %vm45_vm0, %v1380_v48  ;;  %v1378_v50 = vpop.permute.xlu0 %1377 }
 0x5cd   :  { %1384 = vst.msk [vmem:[#allocation9 + $0x20] sm:$0xff] %vm45_vm0, %v1378_v50 }
 0x5cf   :  { %v1389_v9 = vpop.permute.xlu1 %1388 }
 0x5d0   :  { %1394 = vst.msk [vmem:[#allocation9 + $0x38] sm:$0xff] %vm45_vm0, %v1389_v9  ;;  %v1387_v10 = vpop.permute.xlu0 %1386 }
 0x5d1   :  { %1393 = vst.msk [vmem:[#allocation9 + $0x30] sm:$0xff] %vm45_vm0, %v1387_v10 }
 0x5d3   :  { %v1398_v13 = vpop.permute.xlu1 %1397 }
 0x5d4   :  { %1403 = vst.msk [vmem:[#allocation9 + $0x48] sm:$0xff] %vm45_vm0, %v1398_v13  ;;  %v1396_v14 = vpop.permute.xlu0 %1395 }
 0x5d5   :  { %1402 = vst.msk [vmem:[#allocation9 + $0x40] sm:$0xff] %vm45_vm0, %v1396_v14 }
 0x5d7   :  { %v1407_v15 = vpop.permute.xlu1 %1406 }
 0x5d8   :  { %1412 = vst.msk [vmem:[#allocation9 + $0x58] sm:$0xff] %vm45_vm0, %v1407_v15  ;;  %v1405_v16 = vpop.permute.xlu0 %1404 }
 0x5d9   :  { %1411 = vst.msk [vmem:[#allocation9 + $0x50] sm:$0xff] %vm45_vm0, %v1405_v16 }
 0x5db   :  { %v1416_v17 = vpop.permute.xlu1 %1415 }
 0x5dc   :  { %1421 = vst.msk [vmem:[#allocation9 + $0x68] sm:$0xff] %vm45_vm0, %v1416_v17  ;;  %v1414_v18 = vpop.permute.xlu0 %1413 }
 0x5dd   :  { %1420 = vst.msk [vmem:[#allocation9 + $0x60] sm:$0xff] %vm45_vm0, %v1414_v18 }
 0x5df   :  { %v1425_v19 = vpop.permute.xlu1 %1424 }
 0x5e0   :  { %1430 = vst.msk [vmem:[#allocation9 + $0x78] sm:$0xff] %vm45_vm0, %v1425_v19  ;;  %v1423_v20 = vpop.permute.xlu0 %1422 }
 0x5e1   :  { %1429 = vst.msk [vmem:[#allocation9 + $0x70] sm:$0xff] %vm45_vm0, %v1423_v20 }
 0x5e2   :  { %2580 = shalt.err (!%p2577_p6)
}
 0x5e3   :  { %s2581_s30 = scalar_lea.hbm %s2758_s3, 2048 }
 0x5e4   :  { %p2582_p7 = scmp.ne.s32.totalorder %s2758_s3, %s2581_s30  ;;  %p2585_p8 = scmp.lt.u32.totalorder %s2581_s30, %s2758_s3 }
 0x5e6   :  { %p2587_p9 = pnand %p2585_p8, %p2582_p7 }
 0x5e8   :  { %2590 = shalt.err (!%p2587_p9)
}
 0x5e9   :  { %1442 = dma.vmem_to_hbm [thread:$0]  %s1437_s26, 2048, %s2758_s3, [#allocation6], %s2598_s22, %s2598_s22, %s2599_s23  }
 0x5ea   :  { %2595 = dma.done.wait [#allocation6], 2048  }
 0x5eb   :  { %2596 = vsyncadd [#allocation6], 4294965248 }
 0x5ec   :  { %1446 = vsyncpa [#allocation5], 1 }
 0x5ed   :  { %1447 = vsyncpa [#allocation8], 1 }
 0x5ee   :  { %1448 = vsyncpa [#allocation6], 1 }

</bundles_post_ra>
